<compile_context>
chip_gen: v6e
topology: v6e:2x2x1
jax: 0.10.0
libtpu: 0.0.40
codegen_flags: <defaults>
</compile_context>

<pallas_src>
import functools

import jax
import jax.numpy as jnp
from jax.experimental import pallas as pl
from jax.experimental.pallas import tpu as pltpu

# ---------------- model hyper-parameters (small, consistent with the module) ----------
INPUT_SIZE = 16
HIDDEN_SIZE = 32
NUM_LAYERS = 2
OUTPUT_SIZE = 6   # 2 binary logits + 4 multi-class logits
N = 4             # batch
L = 8             # sequence length

# Set to jnp.bfloat16 on v6e / v7x for native-bf16 MXU; keep f32 on v5e.
MATMUL_DTYPE = jnp.float32


def _softmax_last(z):
    z = z - jnp.max(z, axis=-1, keepdims=True)
    e = jnp.exp(z)
    return e / jnp.sum(e, axis=-1, keepdims=True)


def audio_classifier_kernel(num_layers, seq_len, x_ref, lens_ref, *refs):
    """Full forward pass in one kernel invocation (no grid; everything fits VMEM).

    x_ref   : (L*N, INPUT_SIZE) time-major-flattened input (row t*N+n = sample n, step t)
    lens_ref: (N, 1) int32
    refs    = [w_ih_0, w_hh_0, b_0, ..., w_ih_{nl-1}, w_hh_{nl-1}, b_{nl-1},
               w_fc, b_fc, probs_out]
    Gate order along the 4H axis is PyTorch's [i, f, g, o].
    """
    layer_refs = refs[:3 * num_layers]
    w_fc_ref, b_fc_ref, probs_ref = refs[3 * num_layers:]

    Nb = lens_ref.shape[0]
    H = layer_refs[1].shape[0]          # w_hh_0 is (H, 4H)

    lens_m1 = lens_ref[...] - 1         # (N, 1) int32, hoisted out of the loop

    layer_in = x_ref[...]               # (L*N, I) current layer's full input sequence
    last_h = jnp.zeros((Nb, H), jnp.float32)

    for l in range(num_layers):
        w_ih = layer_refs[3 * l][...]       # (in, 4H)
        w_hh = layer_refs[3 * l + 1][...]   # (H, 4H)
        b = layer_refs[3 * l + 2][...]      # (1, 4H) == b_ih + b_hh

        # Hoisted input projection for ALL timesteps at once, bias folded in.
        gates_all = jnp.dot(layer_in.astype(w_ih.dtype), w_ih,
                            preferred_element_type=jnp.float32) + b    # (L*N, 4H)

        h = jnp.zeros((Nb, H), jnp.float32)
        c = jnp.zeros((Nb, H), jnp.float32)
        hs = []
        for t in range(seq_len):            # fully unrolled: seq_len is static & tiny
            g = gates_all[t * Nb:(t + 1) * Nb, :] + jnp.dot(
                h.astype(w_hh.dtype), w_hh, preferred_element_type=jnp.float32)
            # Full-vreg nonlinearities (4H == 128 lanes): 2 EUP pushes, then lane-slice.
            sig = jax.nn.sigmoid(g)
            th = jnp.tanh(g)
            i_g = sig[:, 0 * H:1 * H]
            f_g = sig[:, 1 * H:2 * H]
            g_g = th[:, 2 * H:3 * H]
            o_g = sig[:, 3 * H:4 * H]
            c = f_g * c + i_g * g_g
            h = o_g * jnp.tanh(c)
            if l == num_layers - 1:
                # torch.gather(x, 1, lens-1): keep top-layer hidden state at t == lens-1
                last_h = jnp.where(lens_m1 == t, h, last_h)
            else:
                hs.append(h)
        if l < num_layers - 1:
            layer_in = jnp.concatenate(hs, axis=0)   # (L*N, H) input to next layer

    logits = jnp.dot(last_h.astype(w_fc_ref.dtype), w_fc_ref[...],
                     preferred_element_type=jnp.float32) + b_fc_ref[...]

    bin_p = _softmax_last(logits[:, :2])
    multi_p = _softmax_last(logits[:, 2:])
    # Single lane-contiguous store; wrapper splits into (bin_p, multi_p).
    probs_ref[...] = jnp.concatenate([bin_p, multi_p], axis=-1)


def _cost_estimate(n, seq, input_size, hidden_size, num_layers, output_size):
    h4 = 4 * hidden_size
    flops = 0
    bytes_acc = 4 * (seq * n * input_size) + 4 * n          # x + lens
    for l in range(num_layers):
        in_f = input_size if l == 0 else hidden_size
        flops += 2 * seq * n * in_f * h4                    # hoisted input projection
        flops += 2 * seq * n * hidden_size * h4             # recurrent matmuls
        bytes_acc += 4 * (in_f * h4 + hidden_size * h4 + h4)
    flops += 2 * n * hidden_size * output_size              # fc
    bytes_acc += 4 * (hidden_size * output_size + output_size)
    bytes_acc += 4 * n * output_size                        # output
    trans = num_layers * seq * n * (2 * h4 + hidden_size) + 2 * n * output_size
    return pl.CostEstimate(flops=flops, transcendentals=trans,
                           bytes_accessed=bytes_acc)


def audio_classifier_forward(x, lens, params, *, num_layers=NUM_LAYERS):
    """x: (N, L, INPUT_SIZE) f32, lens: (N,) int.  Returns (bin_p (N,2), multi_p (N,O-2))."""
    n, seq, input_size = x.shape
    hidden_size = params["w_hh0"].shape[0]
    out_size = params["w_fc"].shape[1]

    # Time-major flatten: row t*N + b holds sample b at timestep t.
    x_flat = jnp.transpose(x, (1, 0, 2)).reshape(seq * n, input_size)
    x_flat = x_flat.astype(MATMUL_DTYPE)
    lens2 = lens.astype(jnp.int32).reshape(n, 1)

    operands = [x_flat, lens2]
    for l in range(num_layers):
        operands += [params[f"w_ih{l}"].astype(MATMUL_DTYPE),
                     params[f"w_hh{l}"].astype(MATMUL_DTYPE),
                     params[f"b{l}"]]
    operands += [params["w_fc"].astype(MATMUL_DTYPE), params["b_fc"]]

    vmem = pl.BlockSpec(memory_space=pltpu.MemorySpace.VMEM)
    probs = pl.pallas_call(
        functools.partial(audio_classifier_kernel, num_layers, seq),
        out_shape=jax.ShapeDtypeStruct((n, out_size), jnp.float32),
        in_specs=[vmem] * len(operands),
        out_specs=vmem,
        cost_estimate=_cost_estimate(n, seq, input_size, hidden_size,
                                     num_layers, out_size),
    )(*operands)
    # TODO(synk): at larger batch sizes add a batch grid (parallel) to engage v7x's 2nd TC.
    return probs[:, :2], probs[:, 2:]


# ---------------- deterministic parameter initialization (PyTorch-like U(-k, k)) ------
def init_params(key, input_size, hidden_size, num_layers, output_size):
    k = 1.0 / jnp.sqrt(hidden_size)
    params = {}
    for l in range(num_layers):
        in_f = input_size if l == 0 else hidden_size
        key, k1, k2, k3, k4 = jax.random.split(key, 5)
        params[f"w_ih{l}"] = jax.random.uniform(k1, (in_f, 4 * hidden_size),
                                                jnp.float32, -k, k)
        params[f"w_hh{l}"] = jax.random.uniform(k2, (hidden_size, 4 * hidden_size),
                                                jnp.float32, -k, k)
        b_ih = jax.random.uniform(k3, (4 * hidden_size,), jnp.float32, -k, k)
        b_hh = jax.random.uniform(k4, (4 * hidden_size,), jnp.float32, -k, k)
        params[f"b{l}"] = (b_ih + b_hh).reshape(1, 4 * hidden_size)
    key, k5, k6 = jax.random.split(key, 3)
    kf = 1.0 / jnp.sqrt(hidden_size)
    params["w_fc"] = jax.random.uniform(k5, (hidden_size, output_size),
                                        jnp.float32, -kf, kf)
    params["b_fc"] = jax.random.uniform(k6, (output_size,),
                                        jnp.float32, -kf, kf).reshape(1, output_size)
    return params


# ---------------- pure-JAX reference (for a sanity check) -----------------------------
def reference_forward(x, lens, params, num_layers=NUM_LAYERS):
    n, seq, _ = x.shape
    h_seq = x
    for l in range(num_layers):
        w_ih, w_hh, b = params[f"w_ih{l}"], params[f"w_hh{l}"], params[f"b{l}"]
        H = w_hh.shape[0]

        def cell(carry, x_t):
            h, c = carry
            g = x_t @ w_ih + h @ w_hh + b
            i = jax.nn.sigmoid(g[:, :H])
            f = jax.nn.sigmoid(g[:, H:2 * H])
            gg = jnp.tanh(g[:, 2 * H:3 * H])
            o = jax.nn.sigmoid(g[:, 3 * H:])
            c = f * c + i * gg
            h = o * jnp.tanh(c)
            return (h, c), h

        (_, _), outs = jax.lax.scan(cell,
                                    (jnp.zeros((n, H)), jnp.zeros((n, H))),
                                    jnp.transpose(h_seq, (1, 0, 2)))
        h_seq = jnp.transpose(outs, (1, 0, 2))
    idx = (lens - 1).astype(jnp.int32)
    last = jnp.take_along_axis(h_seq, idx[:, None, None], axis=1)[:, 0, :]
    logits = last @ params["w_fc"] + params["b_fc"]
    return jax.nn.softmax(logits[:, :2], axis=1), jax.nn.softmax(logits[:, 2:], axis=1)


if __name__ == "__main__":
    key = jax.random.PRNGKey(0)
    key, kx, kl, kp = jax.random.split(key, 4)

    x = jax.random.normal(kx, (N, L, INPUT_SIZE), jnp.float32)
    lens = jax.random.randint(kl, (N,), 1, L + 1, dtype=jnp.int32)  # in [1, L]
    params = init_params(kp, INPUT_SIZE, HIDDEN_SIZE, NUM_LAYERS, OUTPUT_SIZE)

    bin_p, multi_p = audio_classifier_forward(x, lens, params)
    bin_p, multi_p = jax.block_until_ready((bin_p, multi_p))

    # sanity checks against the pure-JAX reference
    bin_r, multi_r = reference_forward(x, lens, params)
    assert bin_p.shape == (N, 2) and multi_p.shape == (N, OUTPUT_SIZE - 2)
    assert bool(jnp.all(jnp.isfinite(bin_p))) and bool(jnp.all(jnp.isfinite(multi_p)))
    assert bool(jnp.allclose(jnp.sum(bin_p, axis=1), 1.0, atol=1e-4))
    assert bool(jnp.allclose(jnp.sum(multi_p, axis=1), 1.0, atol=1e-4))
    assert bool(jnp.allclose(bin_p, bin_r, atol=2e-2))
    assert bool(jnp.allclose(multi_p, multi_r, atol=2e-2))

    print("KERNEL_OK")
</pallas_src>

<mosaic_0001>
module attributes {stable_mosaic.version = 11 : i64} {
  func.func @audio_classifier_kernel(%arg0: memref<32x16xf32, #tpu.memory_space<vmem>>, %arg1: memref<4x1xi32, #tpu.memory_space<vmem>>, %arg2: memref<16x128xf32, #tpu.memory_space<vmem>>, %arg3: memref<32x128xf32, #tpu.memory_space<vmem>>, %arg4: memref<1x128xf32, #tpu.memory_space<vmem>>, %arg5: memref<32x128xf32, #tpu.memory_space<vmem>>, %arg6: memref<32x128xf32, #tpu.memory_space<vmem>>, %arg7: memref<1x128xf32, #tpu.memory_space<vmem>>, %arg8: memref<32x6xf32, #tpu.memory_space<vmem>>, %arg9: memref<1x6xf32, #tpu.memory_space<vmem>>, %arg10: memref<4x6xf32, #tpu.memory_space<vmem>>) attributes {dimension_semantics = [], scalar_prefetch = 0 : i64, scratch_operands = 0 : i64, tpu.core_type = #tpu.core_type<tc>} {
    %c0 = arith.constant 0 : index
    %c0_0 = arith.constant 0 : index
    %0 = vector.load %arg1[%c0, %c0_0] : memref<4x1xi32, #tpu.memory_space<vmem>>, vector<4x1xi32>
    %c1_i32 = arith.constant 1 : i32
    %1 = vector.broadcast %c1_i32 : i32 to vector<4x1xi32>
    %2 = arith.subi %0, %1 : vector<4x1xi32>
    %c0_1 = arith.constant 0 : index
    %c0_2 = arith.constant 0 : index
    %3 = vector.load %arg0[%c0_1, %c0_2] : memref<32x16xf32, #tpu.memory_space<vmem>>, vector<32x16xf32>
    %cst = arith.constant 0.000000e+00 : f32
    %4 = vector.broadcast %cst : f32 to vector<4x32xf32>
    %c0_3 = arith.constant 0 : index
    %c0_4 = arith.constant 0 : index
    %5 = vector.load %arg2[%c0_3, %c0_4] : memref<16x128xf32, #tpu.memory_space<vmem>>, vector<16x128xf32>
    %c0_5 = arith.constant 0 : index
    %c0_6 = arith.constant 0 : index
    %6 = vector.load %arg3[%c0_5, %c0_6] : memref<32x128xf32, #tpu.memory_space<vmem>>, vector<32x128xf32>
    %c0_7 = arith.constant 0 : index
    %c0_8 = arith.constant 0 : index
    %7 = vector.load %arg4[%c0_7, %c0_8] : memref<1x128xf32, #tpu.memory_space<vmem>>, vector<1x128xf32>
    %cst_9 = arith.constant dense<0.000000e+00> : vector<32x128xf32>
    %8 = tpu.matmul %3, %5, %cst_9 {dimension_numbers = #tpu.dot_dimension_numbers<[1], [0], [0], [1], [0, 0, 1, 1], [], []>} : vector<32x16xf32>, vector<16x128xf32>, vector<32x128xf32> -> vector<32x128xf32>
    %9 = vector.broadcast %7 : vector<1x128xf32> to vector<32x128xf32>
    %10 = arith.addf %8, %9 : vector<32x128xf32>
    %cst_10 = arith.constant 0.000000e+00 : f32
    %11 = vector.broadcast %cst_10 : f32 to vector<4x32xf32>
    %cst_11 = arith.constant 0.000000e+00 : f32
    %12 = vector.broadcast %cst_11 : f32 to vector<4x32xf32>
    %13 = vector.extract_strided_slice %10 {offsets = [0, 0], sizes = [4, 128], strides = [1, 1]} : vector<32x128xf32> to vector<4x128xf32>
    %cst_12 = arith.constant dense<0.000000e+00> : vector<4x128xf32>
    %14 = tpu.matmul %11, %6, %cst_12 {dimension_numbers = #tpu.dot_dimension_numbers<[1], [0], [0], [1], [0, 0, 1, 1], [], []>} : vector<4x32xf32>, vector<32x128xf32>, vector<4x128xf32> -> vector<4x128xf32>
    %15 = arith.addf %13, %14 : vector<4x128xf32>
    %16 = arith.negf %15 : vector<4x128xf32>
    %17 = math.exp %16 : vector<4x128xf32>
    %cst_13 = arith.constant 1.000000e+00 : f32
    %18 = vector.broadcast %cst_13 : f32 to vector<4x128xf32>
    %19 = arith.addf %18, %17 : vector<4x128xf32>
    %20 = arith.divf %18, %19 : vector<4x128xf32>
    %21 = math.tanh %15 : vector<4x128xf32>
    %22 = vector.extract_strided_slice %20 {offsets = [0, 0], sizes = [4, 32], strides = [1, 1]} : vector<4x128xf32> to vector<4x32xf32>
    %23 = vector.extract_strided_slice %20 {offsets = [0, 32], sizes = [4, 32], strides = [1, 1]} : vector<4x128xf32> to vector<4x32xf32>
    %24 = vector.extract_strided_slice %21 {offsets = [0, 64], sizes = [4, 32], strides = [1, 1]} : vector<4x128xf32> to vector<4x32xf32>
    %25 = vector.extract_strided_slice %20 {offsets = [0, 96], sizes = [4, 32], strides = [1, 1]} : vector<4x128xf32> to vector<4x32xf32>
    %26 = arith.mulf %23, %12 : vector<4x32xf32>
    %27 = arith.mulf %22, %24 : vector<4x32xf32>
    %28 = arith.addf %26, %27 : vector<4x32xf32>
    %29 = math.tanh %28 : vector<4x32xf32>
    %30 = arith.mulf %25, %29 : vector<4x32xf32>
    %31 = vector.extract_strided_slice %10 {offsets = [4, 0], sizes = [4, 128], strides = [1, 1]} : vector<32x128xf32> to vector<4x128xf32>
    %cst_14 = arith.constant dense<0.000000e+00> : vector<4x128xf32>
    %32 = tpu.matmul %30, %6, %cst_14 {dimension_numbers = #tpu.dot_dimension_numbers<[1], [0], [0], [1], [0, 0, 1, 1], [], []>} : vector<4x32xf32>, vector<32x128xf32>, vector<4x128xf32> -> vector<4x128xf32>
    %33 = arith.addf %31, %32 : vector<4x128xf32>
    %34 = arith.negf %33 : vector<4x128xf32>
    %35 = math.exp %34 : vector<4x128xf32>
    %cst_15 = arith.constant 1.000000e+00 : f32
    %36 = vector.broadcast %cst_15 : f32 to vector<4x128xf32>
    %37 = arith.addf %36, %35 : vector<4x128xf32>
    %38 = arith.divf %36, %37 : vector<4x128xf32>
    %39 = math.tanh %33 : vector<4x128xf32>
    %40 = vector.extract_strided_slice %38 {offsets = [0, 0], sizes = [4, 32], strides = [1, 1]} : vector<4x128xf32> to vector<4x32xf32>
    %41 = vector.extract_strided_slice %38 {offsets = [0, 32], sizes = [4, 32], strides = [1, 1]} : vector<4x128xf32> to vector<4x32xf32>
    %42 = vector.extract_strided_slice %39 {offsets = [0, 64], sizes = [4, 32], strides = [1, 1]} : vector<4x128xf32> to vector<4x32xf32>
    %43 = vector.extract_strided_slice %38 {offsets = [0, 96], sizes = [4, 32], strides = [1, 1]} : vector<4x128xf32> to vector<4x32xf32>
    %44 = arith.mulf %41, %28 : vector<4x32xf32>
    %45 = arith.mulf %40, %42 : vector<4x32xf32>
    %46 = arith.addf %44, %45 : vector<4x32xf32>
    %47 = math.tanh %46 : vector<4x32xf32>
    %48 = arith.mulf %43, %47 : vector<4x32xf32>
    %49 = vector.extract_strided_slice %10 {offsets = [8, 0], sizes = [4, 128], strides = [1, 1]} : vector<32x128xf32> to vector<4x128xf32>
    %cst_16 = arith.constant dense<0.000000e+00> : vector<4x128xf32>
    %50 = tpu.matmul %48, %6, %cst_16 {dimension_numbers = #tpu.dot_dimension_numbers<[1], [0], [0], [1], [0, 0, 1, 1], [], []>} : vector<4x32xf32>, vector<32x128xf32>, vector<4x128xf32> -> vector<4x128xf32>
    %51 = arith.addf %49, %50 : vector<4x128xf32>
    %52 = arith.negf %51 : vector<4x128xf32>
    %53 = math.exp %52 : vector<4x128xf32>
    %cst_17 = arith.constant 1.000000e+00 : f32
    %54 = vector.broadcast %cst_17 : f32 to vector<4x128xf32>
    %55 = arith.addf %54, %53 : vector<4x128xf32>
    %56 = arith.divf %54, %55 : vector<4x128xf32>
    %57 = math.tanh %51 : vector<4x128xf32>
    %58 = vector.extract_strided_slice %56 {offsets = [0, 0], sizes = [4, 32], strides = [1, 1]} : vector<4x128xf32> to vector<4x32xf32>
    %59 = vector.extract_strided_slice %56 {offsets = [0, 32], sizes = [4, 32], strides = [1, 1]} : vector<4x128xf32> to vector<4x32xf32>
    %60 = vector.extract_strided_slice %57 {offsets = [0, 64], sizes = [4, 32], strides = [1, 1]} : vector<4x128xf32> to vector<4x32xf32>
    %61 = vector.extract_strided_slice %56 {offsets = [0, 96], sizes = [4, 32], strides = [1, 1]} : vector<4x128xf32> to vector<4x32xf32>
    %62 = arith.mulf %59, %46 : vector<4x32xf32>
    %63 = arith.mulf %58, %60 : vector<4x32xf32>
    %64 = arith.addf %62, %63 : vector<4x32xf32>
    %65 = math.tanh %64 : vector<4x32xf32>
    %66 = arith.mulf %61, %65 : vector<4x32xf32>
    %67 = vector.extract_strided_slice %10 {offsets = [12, 0], sizes = [4, 128], strides = [1, 1]} : vector<32x128xf32> to vector<4x128xf32>
    %cst_18 = arith.constant dense<0.000000e+00> : vector<4x128xf32>
    %68 = tpu.matmul %66, %6, %cst_18 {dimension_numbers = #tpu.dot_dimension_numbers<[1], [0], [0], [1], [0, 0, 1, 1], [], []>} : vector<4x32xf32>, vector<32x128xf32>, vector<4x128xf32> -> vector<4x128xf32>
    %69 = arith.addf %67, %68 : vector<4x128xf32>
    %70 = arith.negf %69 : vector<4x128xf32>
    %71 = math.exp %70 : vector<4x128xf32>
    %cst_19 = arith.constant 1.000000e+00 : f32
    %72 = vector.broadcast %cst_19 : f32 to vector<4x128xf32>
    %73 = arith.addf %72, %71 : vector<4x128xf32>
    %74 = arith.divf %72, %73 : vector<4x128xf32>
    %75 = math.tanh %69 : vector<4x128xf32>
    %76 = vector.extract_strided_slice %74 {offsets = [0, 0], sizes = [4, 32], strides = [1, 1]} : vector<4x128xf32> to vector<4x32xf32>
    %77 = vector.extract_strided_slice %74 {offsets = [0, 32], sizes = [4, 32], strides = [1, 1]} : vector<4x128xf32> to vector<4x32xf32>
    %78 = vector.extract_strided_slice %75 {offsets = [0, 64], sizes = [4, 32], strides = [1, 1]} : vector<4x128xf32> to vector<4x32xf32>
    %79 = vector.extract_strided_slice %74 {offsets = [0, 96], sizes = [4, 32], strides = [1, 1]} : vector<4x128xf32> to vector<4x32xf32>
    %80 = arith.mulf %77, %64 : vector<4x32xf32>
    %81 = arith.mulf %76, %78 : vector<4x32xf32>
    %82 = arith.addf %80, %81 : vector<4x32xf32>
    %83 = math.tanh %82 : vector<4x32xf32>
    %84 = arith.mulf %79, %83 : vector<4x32xf32>
    %85 = vector.extract_strided_slice %10 {offsets = [16, 0], sizes = [4, 128], strides = [1, 1]} : vector<32x128xf32> to vector<4x128xf32>
    %cst_20 = arith.constant dense<0.000000e+00> : vector<4x128xf32>
    %86 = tpu.matmul %84, %6, %cst_20 {dimension_numbers = #tpu.dot_dimension_numbers<[1], [0], [0], [1], [0, 0, 1, 1], [], []>} : vector<4x32xf32>, vector<32x128xf32>, vector<4x128xf32> -> vector<4x128xf32>
    %87 = arith.addf %85, %86 : vector<4x128xf32>
    %88 = arith.negf %87 : vector<4x128xf32>
    %89 = math.exp %88 : vector<4x128xf32>
    %cst_21 = arith.constant 1.000000e+00 : f32
    %90 = vector.broadcast %cst_21 : f32 to vector<4x128xf32>
    %91 = arith.addf %90, %89 : vector<4x128xf32>
    %92 = arith.divf %90, %91 : vector<4x128xf32>
    %93 = math.tanh %87 : vector<4x128xf32>
    %94 = vector.extract_strided_slice %92 {offsets = [0, 0], sizes = [4, 32], strides = [1, 1]} : vector<4x128xf32> to vector<4x32xf32>
    %95 = vector.extract_strided_slice %92 {offsets = [0, 32], sizes = [4, 32], strides = [1, 1]} : vector<4x128xf32> to vector<4x32xf32>
    %96 = vector.extract_strided_slice %93 {offsets = [0, 64], sizes = [4, 32], strides = [1, 1]} : vector<4x128xf32> to vector<4x32xf32>
    %97 = vector.extract_strided_slice %92 {offsets = [0, 96], sizes = [4, 32], strides = [1, 1]} : vector<4x128xf32> to vector<4x32xf32>
    %98 = arith.mulf %95, %82 : vector<4x32xf32>
    %99 = arith.mulf %94, %96 : vector<4x32xf32>
    %100 = arith.addf %98, %99 : vector<4x32xf32>
    %101 = math.tanh %100 : vector<4x32xf32>
    %102 = arith.mulf %97, %101 : vector<4x32xf32>
    %103 = vector.extract_strided_slice %10 {offsets = [20, 0], sizes = [4, 128], strides = [1, 1]} : vector<32x128xf32> to vector<4x128xf32>
    %cst_22 = arith.constant dense<0.000000e+00> : vector<4x128xf32>
    %104 = tpu.matmul %102, %6, %cst_22 {dimension_numbers = #tpu.dot_dimension_numbers<[1], [0], [0], [1], [0, 0, 1, 1], [], []>} : vector<4x32xf32>, vector<32x128xf32>, vector<4x128xf32> -> vector<4x128xf32>
    %105 = arith.addf %103, %104 : vector<4x128xf32>
    %106 = arith.negf %105 : vector<4x128xf32>
    %107 = math.exp %106 : vector<4x128xf32>
    %cst_23 = arith.constant 1.000000e+00 : f32
    %108 = vector.broadcast %cst_23 : f32 to vector<4x128xf32>
    %109 = arith.addf %108, %107 : vector<4x128xf32>
    %110 = arith.divf %108, %109 : vector<4x128xf32>
    %111 = math.tanh %105 : vector<4x128xf32>
    %112 = vector.extract_strided_slice %110 {offsets = [0, 0], sizes = [4, 32], strides = [1, 1]} : vector<4x128xf32> to vector<4x32xf32>
    %113 = vector.extract_strided_slice %110 {offsets = [0, 32], sizes = [4, 32], strides = [1, 1]} : vector<4x128xf32> to vector<4x32xf32>
    %114 = vector.extract_strided_slice %111 {offsets = [0, 64], sizes = [4, 32], strides = [1, 1]} : vector<4x128xf32> to vector<4x32xf32>
    %115 = vector.extract_strided_slice %110 {offsets = [0, 96], sizes = [4, 32], strides = [1, 1]} : vector<4x128xf32> to vector<4x32xf32>
    %116 = arith.mulf %113, %100 : vector<4x32xf32>
    %117 = arith.mulf %112, %114 : vector<4x32xf32>
    %118 = arith.addf %116, %117 : vector<4x32xf32>
    %119 = math.tanh %118 : vector<4x32xf32>
    %120 = arith.mulf %115, %119 : vector<4x32xf32>
    %121 = vector.extract_strided_slice %10 {offsets = [24, 0], sizes = [4, 128], strides = [1, 1]} : vector<32x128xf32> to vector<4x128xf32>
    %cst_24 = arith.constant dense<0.000000e+00> : vector<4x128xf32>
    %122 = tpu.matmul %120, %6, %cst_24 {dimension_numbers = #tpu.dot_dimension_numbers<[1], [0], [0], [1], [0, 0, 1, 1], [], []>} : vector<4x32xf32>, vector<32x128xf32>, vector<4x128xf32> -> vector<4x128xf32>
    %123 = arith.addf %121, %122 : vector<4x128xf32>
    %124 = arith.negf %123 : vector<4x128xf32>
    %125 = math.exp %124 : vector<4x128xf32>
    %cst_25 = arith.constant 1.000000e+00 : f32
    %126 = vector.broadcast %cst_25 : f32 to vector<4x128xf32>
    %127 = arith.addf %126, %125 : vector<4x128xf32>
    %128 = arith.divf %126, %127 : vector<4x128xf32>
    %129 = math.tanh %123 : vector<4x128xf32>
    %130 = vector.extract_strided_slice %128 {offsets = [0, 0], sizes = [4, 32], strides = [1, 1]} : vector<4x128xf32> to vector<4x32xf32>
    %131 = vector.extract_strided_slice %128 {offsets = [0, 32], sizes = [4, 32], strides = [1, 1]} : vector<4x128xf32> to vector<4x32xf32>
    %132 = vector.extract_strided_slice %129 {offsets = [0, 64], sizes = [4, 32], strides = [1, 1]} : vector<4x128xf32> to vector<4x32xf32>
    %133 = vector.extract_strided_slice %128 {offsets = [0, 96], sizes = [4, 32], strides = [1, 1]} : vector<4x128xf32> to vector<4x32xf32>
    %134 = arith.mulf %131, %118 : vector<4x32xf32>
    %135 = arith.mulf %130, %132 : vector<4x32xf32>
    %136 = arith.addf %134, %135 : vector<4x32xf32>
    %137 = math.tanh %136 : vector<4x32xf32>
    %138 = arith.mulf %133, %137 : vector<4x32xf32>
    %139 = vector.extract_strided_slice %10 {offsets = [28, 0], sizes = [4, 128], strides = [1, 1]} : vector<32x128xf32> to vector<4x128xf32>
    %cst_26 = arith.constant dense<0.000000e+00> : vector<4x128xf32>
    %140 = tpu.matmul %138, %6, %cst_26 {dimension_numbers = #tpu.dot_dimension_numbers<[1], [0], [0], [1], [0, 0, 1, 1], [], []>} : vector<4x32xf32>, vector<32x128xf32>, vector<4x128xf32> -> vector<4x128xf32>
    %141 = arith.addf %139, %140 : vector<4x128xf32>
    %142 = arith.negf %141 : vector<4x128xf32>
    %143 = math.exp %142 : vector<4x128xf32>
    %cst_27 = arith.constant 1.000000e+00 : f32
    %144 = vector.broadcast %cst_27 : f32 to vector<4x128xf32>
    %145 = arith.addf %144, %143 : vector<4x128xf32>
    %146 = arith.divf %144, %145 : vector<4x128xf32>
    %147 = math.tanh %141 : vector<4x128xf32>
    %148 = vector.extract_strided_slice %146 {offsets = [0, 0], sizes = [4, 32], strides = [1, 1]} : vector<4x128xf32> to vector<4x32xf32>
    %149 = vector.extract_strided_slice %146 {offsets = [0, 32], sizes = [4, 32], strides = [1, 1]} : vector<4x128xf32> to vector<4x32xf32>
    %150 = vector.extract_strided_slice %147 {offsets = [0, 64], sizes = [4, 32], strides = [1, 1]} : vector<4x128xf32> to vector<4x32xf32>
    %151 = vector.extract_strided_slice %146 {offsets = [0, 96], sizes = [4, 32], strides = [1, 1]} : vector<4x128xf32> to vector<4x32xf32>
    %152 = arith.mulf %149, %136 : vector<4x32xf32>
    %153 = arith.mulf %148, %150 : vector<4x32xf32>
    %154 = arith.addf %152, %153 : vector<4x32xf32>
    %155 = math.tanh %154 : vector<4x32xf32>
    %156 = arith.mulf %151, %155 : vector<4x32xf32>
    %157 = tpu.concatenate %30, %48, %66, %84, %102, %120, %138, %156 in 0 : vector<4x32xf32>, vector<4x32xf32>, vector<4x32xf32>, vector<4x32xf32>, vector<4x32xf32>, vector<4x32xf32>, vector<4x32xf32>, vector<4x32xf32> -> vector<32x32xf32>
    %c0_28 = arith.constant 0 : index
    %c0_29 = arith.constant 0 : index
    %158 = vector.load %arg5[%c0_28, %c0_29] : memref<32x128xf32, #tpu.memory_space<vmem>>, vector<32x128xf32>
    %c0_30 = arith.constant 0 : index
    %c0_31 = arith.constant 0 : index
    %159 = vector.load %arg6[%c0_30, %c0_31] : memref<32x128xf32, #tpu.memory_space<vmem>>, vector<32x128xf32>
    %c0_32 = arith.constant 0 : index
    %c0_33 = arith.constant 0 : index
    %160 = vector.load %arg7[%c0_32, %c0_33] : memref<1x128xf32, #tpu.memory_space<vmem>>, vector<1x128xf32>
    %cst_34 = arith.constant dense<0.000000e+00> : vector<32x128xf32>
    %161 = tpu.matmul %157, %158, %cst_34 {dimension_numbers = #tpu.dot_dimension_numbers<[1], [0], [0], [1], [0, 0, 1, 1], [], []>} : vector<32x32xf32>, vector<32x128xf32>, vector<32x128xf32> -> vector<32x128xf32>
    %162 = vector.broadcast %160 : vector<1x128xf32> to vector<32x128xf32>
    %163 = arith.addf %161, %162 : vector<32x128xf32>
    %cst_35 = arith.constant 0.000000e+00 : f32
    %164 = vector.broadcast %cst_35 : f32 to vector<4x32xf32>
    %cst_36 = arith.constant 0.000000e+00 : f32
    %165 = vector.broadcast %cst_36 : f32 to vector<4x32xf32>
    %166 = vector.extract_strided_slice %163 {offsets = [0, 0], sizes = [4, 128], strides = [1, 1]} : vector<32x128xf32> to vector<4x128xf32>
    %cst_37 = arith.constant dense<0.000000e+00> : vector<4x128xf32>
    %167 = tpu.matmul %164, %159, %cst_37 {dimension_numbers = #tpu.dot_dimension_numbers<[1], [0], [0], [1], [0, 0, 1, 1], [], []>} : vector<4x32xf32>, vector<32x128xf32>, vector<4x128xf32> -> vector<4x128xf32>
    %168 = arith.addf %166, %167 : vector<4x128xf32>
    %169 = arith.negf %168 : vector<4x128xf32>
    %170 = math.exp %169 : vector<4x128xf32>
    %cst_38 = arith.constant 1.000000e+00 : f32
    %171 = vector.broadcast %cst_38 : f32 to vector<4x128xf32>
    %172 = arith.addf %171, %170 : vector<4x128xf32>
    %173 = arith.divf %171, %172 : vector<4x128xf32>
    %174 = math.tanh %168 : vector<4x128xf32>
    %175 = vector.extract_strided_slice %173 {offsets = [0, 0], sizes = [4, 32], strides = [1, 1]} : vector<4x128xf32> to vector<4x32xf32>
    %176 = vector.extract_strided_slice %173 {offsets = [0, 32], sizes = [4, 32], strides = [1, 1]} : vector<4x128xf32> to vector<4x32xf32>
    %177 = vector.extract_strided_slice %174 {offsets = [0, 64], sizes = [4, 32], strides = [1, 1]} : vector<4x128xf32> to vector<4x32xf32>
    %178 = vector.extract_strided_slice %173 {offsets = [0, 96], sizes = [4, 32], strides = [1, 1]} : vector<4x128xf32> to vector<4x32xf32>
    %179 = arith.mulf %176, %165 : vector<4x32xf32>
    %180 = arith.mulf %175, %177 : vector<4x32xf32>
    %181 = arith.addf %179, %180 : vector<4x32xf32>
    %182 = math.tanh %181 : vector<4x32xf32>
    %183 = arith.mulf %178, %182 : vector<4x32xf32>
    %c0_i32 = arith.constant 0 : i32
    %184 = vector.broadcast %c0_i32 : i32 to vector<4x1xi32>
    %185 = arith.cmpi eq, %2, %184 : vector<4x1xi32>
    %186 = vector.shape_cast %185 : vector<4x1xi1> to vector<4x1xi1>
    %187 = vector.broadcast %186 : vector<4x1xi1> to vector<4x32xi1>
    %188 = arith.select %187, %183, %4 : vector<4x32xi1>, vector<4x32xf32>
    %189 = vector.extract_strided_slice %163 {offsets = [4, 0], sizes = [4, 128], strides = [1, 1]} : vector<32x128xf32> to vector<4x128xf32>
    %cst_39 = arith.constant dense<0.000000e+00> : vector<4x128xf32>
    %190 = tpu.matmul %183, %159, %cst_39 {dimension_numbers = #tpu.dot_dimension_numbers<[1], [0], [0], [1], [0, 0, 1, 1], [], []>} : vector<4x32xf32>, vector<32x128xf32>, vector<4x128xf32> -> vector<4x128xf32>
    %191 = arith.addf %189, %190 : vector<4x128xf32>
    %192 = arith.negf %191 : vector<4x128xf32>
    %193 = math.exp %192 : vector<4x128xf32>
    %cst_40 = arith.constant 1.000000e+00 : f32
    %194 = vector.broadcast %cst_40 : f32 to vector<4x128xf32>
    %195 = arith.addf %194, %193 : vector<4x128xf32>
    %196 = arith.divf %194, %195 : vector<4x128xf32>
    %197 = math.tanh %191 : vector<4x128xf32>
    %198 = vector.extract_strided_slice %196 {offsets = [0, 0], sizes = [4, 32], strides = [1, 1]} : vector<4x128xf32> to vector<4x32xf32>
    %199 = vector.extract_strided_slice %196 {offsets = [0, 32], sizes = [4, 32], strides = [1, 1]} : vector<4x128xf32> to vector<4x32xf32>
    %200 = vector.extract_strided_slice %197 {offsets = [0, 64], sizes = [4, 32], strides = [1, 1]} : vector<4x128xf32> to vector<4x32xf32>
    %201 = vector.extract_strided_slice %196 {offsets = [0, 96], sizes = [4, 32], strides = [1, 1]} : vector<4x128xf32> to vector<4x32xf32>
    %202 = arith.mulf %199, %181 : vector<4x32xf32>
    %203 = arith.mulf %198, %200 : vector<4x32xf32>
    %204 = arith.addf %202, %203 : vector<4x32xf32>
    %205 = math.tanh %204 : vector<4x32xf32>
    %206 = arith.mulf %201, %205 : vector<4x32xf32>
    %c1_i32_41 = arith.constant 1 : i32
    %207 = vector.broadcast %c1_i32_41 : i32 to vector<4x1xi32>
    %208 = arith.cmpi eq, %2, %207 : vector<4x1xi32>
    %209 = vector.shape_cast %208 : vector<4x1xi1> to vector<4x1xi1>
    %210 = vector.broadcast %209 : vector<4x1xi1> to vector<4x32xi1>
    %211 = arith.select %210, %206, %188 : vector<4x32xi1>, vector<4x32xf32>
    %212 = vector.extract_strided_slice %163 {offsets = [8, 0], sizes = [4, 128], strides = [1, 1]} : vector<32x128xf32> to vector<4x128xf32>
    %cst_42 = arith.constant dense<0.000000e+00> : vector<4x128xf32>
    %213 = tpu.matmul %206, %159, %cst_42 {dimension_numbers = #tpu.dot_dimension_numbers<[1], [0], [0], [1], [0, 0, 1, 1], [], []>} : vector<4x32xf32>, vector<32x128xf32>, vector<4x128xf32> -> vector<4x128xf32>
    %214 = arith.addf %212, %213 : vector<4x128xf32>
    %215 = arith.negf %214 : vector<4x128xf32>
    %216 = math.exp %215 : vector<4x128xf32>
    %cst_43 = arith.constant 1.000000e+00 : f32
    %217 = vector.broadcast %cst_43 : f32 to vector<4x128xf32>
    %218 = arith.addf %217, %216 : vector<4x128xf32>
    %219 = arith.divf %217, %218 : vector<4x128xf32>
    %220 = math.tanh %214 : vector<4x128xf32>
    %221 = vector.extract_strided_slice %219 {offsets = [0, 0], sizes = [4, 32], strides = [1, 1]} : vector<4x128xf32> to vector<4x32xf32>
    %222 = vector.extract_strided_slice %219 {offsets = [0, 32], sizes = [4, 32], strides = [1, 1]} : vector<4x128xf32> to vector<4x32xf32>
    %223 = vector.extract_strided_slice %220 {offsets = [0, 64], sizes = [4, 32], strides = [1, 1]} : vector<4x128xf32> to vector<4x32xf32>
    %224 = vector.extract_strided_slice %219 {offsets = [0, 96], sizes = [4, 32], strides = [1, 1]} : vector<4x128xf32> to vector<4x32xf32>
    %225 = arith.mulf %222, %204 : vector<4x32xf32>
    %226 = arith.mulf %221, %223 : vector<4x32xf32>
    %227 = arith.addf %225, %226 : vector<4x32xf32>
    %228 = math.tanh %227 : vector<4x32xf32>
    %229 = arith.mulf %224, %228 : vector<4x32xf32>
    %c2_i32 = arith.constant 2 : i32
    %230 = vector.broadcast %c2_i32 : i32 to vector<4x1xi32>
    %231 = arith.cmpi eq, %2, %230 : vector<4x1xi32>
    %232 = vector.shape_cast %231 : vector<4x1xi1> to vector<4x1xi1>
    %233 = vector.broadcast %232 : vector<4x1xi1> to vector<4x32xi1>
    %234 = arith.select %233, %229, %211 : vector<4x32xi1>, vector<4x32xf32>
    %235 = vector.extract_strided_slice %163 {offsets = [12, 0], sizes = [4, 128], strides = [1, 1]} : vector<32x128xf32> to vector<4x128xf32>
    %cst_44 = arith.constant dense<0.000000e+00> : vector<4x128xf32>
    %236 = tpu.matmul %229, %159, %cst_44 {dimension_numbers = #tpu.dot_dimension_numbers<[1], [0], [0], [1], [0, 0, 1, 1], [], []>} : vector<4x32xf32>, vector<32x128xf32>, vector<4x128xf32> -> vector<4x128xf32>
    %237 = arith.addf %235, %236 : vector<4x128xf32>
    %238 = arith.negf %237 : vector<4x128xf32>
    %239 = math.exp %238 : vector<4x128xf32>
    %cst_45 = arith.constant 1.000000e+00 : f32
    %240 = vector.broadcast %cst_45 : f32 to vector<4x128xf32>
    %241 = arith.addf %240, %239 : vector<4x128xf32>
    %242 = arith.divf %240, %241 : vector<4x128xf32>
    %243 = math.tanh %237 : vector<4x128xf32>
    %244 = vector.extract_strided_slice %242 {offsets = [0, 0], sizes = [4, 32], strides = [1, 1]} : vector<4x128xf32> to vector<4x32xf32>
    %245 = vector.extract_strided_slice %242 {offsets = [0, 32], sizes = [4, 32], strides = [1, 1]} : vector<4x128xf32> to vector<4x32xf32>
    %246 = vector.extract_strided_slice %243 {offsets = [0, 64], sizes = [4, 32], strides = [1, 1]} : vector<4x128xf32> to vector<4x32xf32>
    %247 = vector.extract_strided_slice %242 {offsets = [0, 96], sizes = [4, 32], strides = [1, 1]} : vector<4x128xf32> to vector<4x32xf32>
    %248 = arith.mulf %245, %227 : vector<4x32xf32>
    %249 = arith.mulf %244, %246 : vector<4x32xf32>
    %250 = arith.addf %248, %249 : vector<4x32xf32>
    %251 = math.tanh %250 : vector<4x32xf32>
    %252 = arith.mulf %247, %251 : vector<4x32xf32>
    %c3_i32 = arith.constant 3 : i32
    %253 = vector.broadcast %c3_i32 : i32 to vector<4x1xi32>
    %254 = arith.cmpi eq, %2, %253 : vector<4x1xi32>
    %255 = vector.shape_cast %254 : vector<4x1xi1> to vector<4x1xi1>
    %256 = vector.broadcast %255 : vector<4x1xi1> to vector<4x32xi1>
    %257 = arith.select %256, %252, %234 : vector<4x32xi1>, vector<4x32xf32>
    %258 = vector.extract_strided_slice %163 {offsets = [16, 0], sizes = [4, 128], strides = [1, 1]} : vector<32x128xf32> to vector<4x128xf32>
    %cst_46 = arith.constant dense<0.000000e+00> : vector<4x128xf32>
    %259 = tpu.matmul %252, %159, %cst_46 {dimension_numbers = #tpu.dot_dimension_numbers<[1], [0], [0], [1], [0, 0, 1, 1], [], []>} : vector<4x32xf32>, vector<32x128xf32>, vector<4x128xf32> -> vector<4x128xf32>
    %260 = arith.addf %258, %259 : vector<4x128xf32>
    %261 = arith.negf %260 : vector<4x128xf32>
    %262 = math.exp %261 : vector<4x128xf32>
    %cst_47 = arith.constant 1.000000e+00 : f32
    %263 = vector.broadcast %cst_47 : f32 to vector<4x128xf32>
    %264 = arith.addf %263, %262 : vector<4x128xf32>
    %265 = arith.divf %263, %264 : vector<4x128xf32>
    %266 = math.tanh %260 : vector<4x128xf32>
    %267 = vector.extract_strided_slice %265 {offsets = [0, 0], sizes = [4, 32], strides = [1, 1]} : vector<4x128xf32> to vector<4x32xf32>
    %268 = vector.extract_strided_slice %265 {offsets = [0, 32], sizes = [4, 32], strides = [1, 1]} : vector<4x128xf32> to vector<4x32xf32>
    %269 = vector.extract_strided_slice %266 {offsets = [0, 64], sizes = [4, 32], strides = [1, 1]} : vector<4x128xf32> to vector<4x32xf32>
    %270 = vector.extract_strided_slice %265 {offsets = [0, 96], sizes = [4, 32], strides = [1, 1]} : vector<4x128xf32> to vector<4x32xf32>
    %271 = arith.mulf %268, %250 : vector<4x32xf32>
    %272 = arith.mulf %267, %269 : vector<4x32xf32>
    %273 = arith.addf %271, %272 : vector<4x32xf32>
    %274 = math.tanh %273 : vector<4x32xf32>
    %275 = arith.mulf %270, %274 : vector<4x32xf32>
    %c4_i32 = arith.constant 4 : i32
    %276 = vector.broadcast %c4_i32 : i32 to vector<4x1xi32>
    %277 = arith.cmpi eq, %2, %276 : vector<4x1xi32>
    %278 = vector.shape_cast %277 : vector<4x1xi1> to vector<4x1xi1>
    %279 = vector.broadcast %278 : vector<4x1xi1> to vector<4x32xi1>
    %280 = arith.select %279, %275, %257 : vector<4x32xi1>, vector<4x32xf32>
    %281 = vector.extract_strided_slice %163 {offsets = [20, 0], sizes = [4, 128], strides = [1, 1]} : vector<32x128xf32> to vector<4x128xf32>
    %cst_48 = arith.constant dense<0.000000e+00> : vector<4x128xf32>
    %282 = tpu.matmul %275, %159, %cst_48 {dimension_numbers = #tpu.dot_dimension_numbers<[1], [0], [0], [1], [0, 0, 1, 1], [], []>} : vector<4x32xf32>, vector<32x128xf32>, vector<4x128xf32> -> vector<4x128xf32>
    %283 = arith.addf %281, %282 : vector<4x128xf32>
    %284 = arith.negf %283 : vector<4x128xf32>
    %285 = math.exp %284 : vector<4x128xf32>
    %cst_49 = arith.constant 1.000000e+00 : f32
    %286 = vector.broadcast %cst_49 : f32 to vector<4x128xf32>
    %287 = arith.addf %286, %285 : vector<4x128xf32>
    %288 = arith.divf %286, %287 : vector<4x128xf32>
    %289 = math.tanh %283 : vector<4x128xf32>
    %290 = vector.extract_strided_slice %288 {offsets = [0, 0], sizes = [4, 32], strides = [1, 1]} : vector<4x128xf32> to vector<4x32xf32>
    %291 = vector.extract_strided_slice %288 {offsets = [0, 32], sizes = [4, 32], strides = [1, 1]} : vector<4x128xf32> to vector<4x32xf32>
    %292 = vector.extract_strided_slice %289 {offsets = [0, 64], sizes = [4, 32], strides = [1, 1]} : vector<4x128xf32> to vector<4x32xf32>
    %293 = vector.extract_strided_slice %288 {offsets = [0, 96], sizes = [4, 32], strides = [1, 1]} : vector<4x128xf32> to vector<4x32xf32>
    %294 = arith.mulf %291, %273 : vector<4x32xf32>
    %295 = arith.mulf %290, %292 : vector<4x32xf32>
    %296 = arith.addf %294, %295 : vector<4x32xf32>
    %297 = math.tanh %296 : vector<4x32xf32>
    %298 = arith.mulf %293, %297 : vector<4x32xf32>
    %c5_i32 = arith.constant 5 : i32
    %299 = vector.broadcast %c5_i32 : i32 to vector<4x1xi32>
    %300 = arith.cmpi eq, %2, %299 : vector<4x1xi32>
    %301 = vector.shape_cast %300 : vector<4x1xi1> to vector<4x1xi1>
    %302 = vector.broadcast %301 : vector<4x1xi1> to vector<4x32xi1>
    %303 = arith.select %302, %298, %280 : vector<4x32xi1>, vector<4x32xf32>
    %304 = vector.extract_strided_slice %163 {offsets = [24, 0], sizes = [4, 128], strides = [1, 1]} : vector<32x128xf32> to vector<4x128xf32>
    %cst_50 = arith.constant dense<0.000000e+00> : vector<4x128xf32>
    %305 = tpu.matmul %298, %159, %cst_50 {dimension_numbers = #tpu.dot_dimension_numbers<[1], [0], [0], [1], [0, 0, 1, 1], [], []>} : vector<4x32xf32>, vector<32x128xf32>, vector<4x128xf32> -> vector<4x128xf32>
    %306 = arith.addf %304, %305 : vector<4x128xf32>
    %307 = arith.negf %306 : vector<4x128xf32>
    %308 = math.exp %307 : vector<4x128xf32>
    %cst_51 = arith.constant 1.000000e+00 : f32
    %309 = vector.broadcast %cst_51 : f32 to vector<4x128xf32>
    %310 = arith.addf %309, %308 : vector<4x128xf32>
    %311 = arith.divf %309, %310 : vector<4x128xf32>
    %312 = math.tanh %306 : vector<4x128xf32>
    %313 = vector.extract_strided_slice %311 {offsets = [0, 0], sizes = [4, 32], strides = [1, 1]} : vector<4x128xf32> to vector<4x32xf32>
    %314 = vector.extract_strided_slice %311 {offsets = [0, 32], sizes = [4, 32], strides = [1, 1]} : vector<4x128xf32> to vector<4x32xf32>
    %315 = vector.extract_strided_slice %312 {offsets = [0, 64], sizes = [4, 32], strides = [1, 1]} : vector<4x128xf32> to vector<4x32xf32>
    %316 = vector.extract_strided_slice %311 {offsets = [0, 96], sizes = [4, 32], strides = [1, 1]} : vector<4x128xf32> to vector<4x32xf32>
    %317 = arith.mulf %314, %296 : vector<4x32xf32>
    %318 = arith.mulf %313, %315 : vector<4x32xf32>
    %319 = arith.addf %317, %318 : vector<4x32xf32>
    %320 = math.tanh %319 : vector<4x32xf32>
    %321 = arith.mulf %316, %320 : vector<4x32xf32>
    %c6_i32 = arith.constant 6 : i32
    %322 = vector.broadcast %c6_i32 : i32 to vector<4x1xi32>
    %323 = arith.cmpi eq, %2, %322 : vector<4x1xi32>
    %324 = vector.shape_cast %323 : vector<4x1xi1> to vector<4x1xi1>
    %325 = vector.broadcast %324 : vector<4x1xi1> to vector<4x32xi1>
    %326 = arith.select %325, %321, %303 : vector<4x32xi1>, vector<4x32xf32>
    %327 = vector.extract_strided_slice %163 {offsets = [28, 0], sizes = [4, 128], strides = [1, 1]} : vector<32x128xf32> to vector<4x128xf32>
    %cst_52 = arith.constant dense<0.000000e+00> : vector<4x128xf32>
    %328 = tpu.matmul %321, %159, %cst_52 {dimension_numbers = #tpu.dot_dimension_numbers<[1], [0], [0], [1], [0, 0, 1, 1], [], []>} : vector<4x32xf32>, vector<32x128xf32>, vector<4x128xf32> -> vector<4x128xf32>
    %329 = arith.addf %327, %328 : vector<4x128xf32>
    %330 = arith.negf %329 : vector<4x128xf32>
    %331 = math.exp %330 : vector<4x128xf32>
    %cst_53 = arith.constant 1.000000e+00 : f32
    %332 = vector.broadcast %cst_53 : f32 to vector<4x128xf32>
    %333 = arith.addf %332, %331 : vector<4x128xf32>
    %334 = arith.divf %332, %333 : vector<4x128xf32>
    %335 = math.tanh %329 : vector<4x128xf32>
    %336 = vector.extract_strided_slice %334 {offsets = [0, 0], sizes = [4, 32], strides = [1, 1]} : vector<4x128xf32> to vector<4x32xf32>
    %337 = vector.extract_strided_slice %334 {offsets = [0, 32], sizes = [4, 32], strides = [1, 1]} : vector<4x128xf32> to vector<4x32xf32>
    %338 = vector.extract_strided_slice %335 {offsets = [0, 64], sizes = [4, 32], strides = [1, 1]} : vector<4x128xf32> to vector<4x32xf32>
    %339 = vector.extract_strided_slice %334 {offsets = [0, 96], sizes = [4, 32], strides = [1, 1]} : vector<4x128xf32> to vector<4x32xf32>
    %340 = arith.mulf %337, %319 : vector<4x32xf32>
    %341 = arith.mulf %336, %338 : vector<4x32xf32>
    %342 = arith.addf %340, %341 : vector<4x32xf32>
    %343 = math.tanh %342 : vector<4x32xf32>
    %344 = arith.mulf %339, %343 : vector<4x32xf32>
    %c7_i32 = arith.constant 7 : i32
    %345 = vector.broadcast %c7_i32 : i32 to vector<4x1xi32>
    %346 = arith.cmpi eq, %2, %345 : vector<4x1xi32>
    %347 = vector.shape_cast %346 : vector<4x1xi1> to vector<4x1xi1>
    %348 = vector.broadcast %347 : vector<4x1xi1> to vector<4x32xi1>
    %349 = arith.select %348, %344, %326 : vector<4x32xi1>, vector<4x32xf32>
    %c0_54 = arith.constant 0 : index
    %c0_55 = arith.constant 0 : index
    %350 = vector.load %arg8[%c0_54, %c0_55] : memref<32x6xf32, #tpu.memory_space<vmem>>, vector<32x6xf32>
    %cst_56 = arith.constant dense<0.000000e+00> : vector<4x6xf32>
    %351 = tpu.matmul %349, %350, %cst_56 {dimension_numbers = #tpu.dot_dimension_numbers<[1], [0], [0], [1], [0, 0, 1, 1], [], []>} : vector<4x32xf32>, vector<32x6xf32>, vector<4x6xf32> -> vector<4x6xf32>
    %c0_57 = arith.constant 0 : index
    %c0_58 = arith.constant 0 : index
    %352 = vector.load %arg9[%c0_57, %c0_58] : memref<1x6xf32, #tpu.memory_space<vmem>>, vector<1x6xf32>
    %353 = vector.broadcast %352 : vector<1x6xf32> to vector<4x6xf32>
    %354 = arith.addf %351, %353 : vector<4x6xf32>
    %355 = vector.extract_strided_slice %354 {offsets = [0, 0], sizes = [4, 2], strides = [1, 1]} : vector<4x6xf32> to vector<4x2xf32>
    %cst_59 = arith.constant dense<0xFF800000> : vector<4xf32>
    %356 = vector.multi_reduction <maximumf>, %355, %cst_59 [1] : vector<4x2xf32> to vector<4xf32>
    %357 = vector.shape_cast %356 : vector<4xf32> to vector<4x1xf32>
    %358 = vector.broadcast %357 : vector<4x1xf32> to vector<4x2xf32>
    %359 = arith.subf %355, %358 : vector<4x2xf32>
    %360 = math.exp %359 : vector<4x2xf32>
    %cst_60 = arith.constant dense<0.000000e+00> : vector<4xf32>
    %361 = vector.multi_reduction <add>, %360, %cst_60 [1] : vector<4x2xf32> to vector<4xf32>
    %362 = vector.shape_cast %361 : vector<4xf32> to vector<4x1xf32>
    %363 = vector.broadcast %362 : vector<4x1xf32> to vector<4x2xf32>
    %364 = arith.divf %360, %363 : vector<4x2xf32>
    %365 = vector.extract_strided_slice %354 {offsets = [0, 2], sizes = [4, 4], strides = [1, 1]} : vector<4x6xf32> to vector<4x4xf32>
    %cst_61 = arith.constant dense<0xFF800000> : vector<4xf32>
    %366 = vector.multi_reduction <maximumf>, %365, %cst_61 [1] : vector<4x4xf32> to vector<4xf32>
    %367 = vector.shape_cast %366 : vector<4xf32> to vector<4x1xf32>
    %368 = vector.broadcast %367 : vector<4x1xf32> to vector<4x4xf32>
    %369 = arith.subf %365, %368 : vector<4x4xf32>
    %370 = math.exp %369 : vector<4x4xf32>
    %cst_62 = arith.constant dense<0.000000e+00> : vector<4xf32>
    %371 = vector.multi_reduction <add>, %370, %cst_62 [1] : vector<4x4xf32> to vector<4xf32>
    %372 = vector.shape_cast %371 : vector<4xf32> to vector<4x1xf32>
    %373 = vector.broadcast %372 : vector<4x1xf32> to vector<4x4xf32>
    %374 = arith.divf %370, %373 : vector<4x4xf32>
    %375 = tpu.concatenate %364, %374 in 1 : vector<4x2xf32>, vector<4x4xf32> -> vector<4x6xf32>
    %c0_63 = arith.constant 0 : index
    %c0_64 = arith.constant 0 : index
    %376 = vector.load %arg10[%c0_63, %c0_64] : memref<4x6xf32, #tpu.memory_space<vmem>>, vector<4x6xf32>
    tpu.vector_store %arg10[%c0_63, %c0_64], %375 {strides = array<i32>} : memref<4x6xf32, #tpu.memory_space<vmem>>, vector<4x6xf32>,
    return
  }
}

</mosaic_0001>

<bundles_post_ra>
// kernel: tpu_custom_call.1
= control target key start
LH: loop header
LB: loop body
LE: loop exit
PB: predicated region body
PF: predicated region fallthrough
CT: control target
= control target key end

     0   :  { %15 = vsyncpa [#allocation3], 0  ;;  %s3322_s0 = inlined_call_operand.vmem [shape: f32[32,16], index: 0, kind: input, shape index: {}]   ;;  %s3323_s1 = inlined_call_operand.vmem [shape: s32[4,1], index: 1, kind: input, shape index: {}]   ;;  %s3324_s2 = inlined_call_operand.hbm [shape: f32[16,128], index: 2, kind: input, shape index: {}]   ;;  %s3325_s3 = inlined_call_operand.vmem [shape: f32[32,128], index: 3, kind: input, shape index: {}]   ;;  %s3326_s4 = inlined_call_operand.vmem [shape: f32[1,128], index: 4, kind: input, shape index: {}]   ;;  %s3327_s5 = inlined_call_operand.vmem [shape: f32[32,128], index: 5, kind: input, shape index: {}]   ;;  %s3328_s6 = inlined_call_operand.vmem [shape: f32[32,128], index: 6, kind: input, shape index: {}]   ;;  %s3329_s7 = inlined_call_operand.hbm [shape: f32[1,128], index: 7, kind: input, shape index: {}]   ;;  %s3330_s8 = inlined_call_operand.vmem [shape: f32[32,6], index: 8, kind: input, shape index: {}]   ;;  %s3331_s9 = inlined_call_operand.vmem [shape: f32[1,6], index: 9, kind: input, shape index: {}]   ;;  %s3332_s10 = inlined_call_operand.hbm [shape: f32[4,6], index: 10, kind: output, shape index: {}]  }
   0x1   :  { %16 = vsyncpa [#allocation6], 0 }
   0x2   :  { %17 = vsyncpa [#allocation4], 0  ;;  %s2764_s13 = smov [#allocation2]  }
   0x3   :  { %s27_s14 = sshll.u32 %s2764_s13, 4  ;;  %s28_s14 = int_to_ptr.vmem [resolvable:$true] %s27_s14 }
   0x4   :  { %s2706_s15 = scalar_lea.vmem %s28_s14, 256  ;;  %p2711_p1 = scmp.lt.s32.totalorder %s28_s14, %s28_s14 }
   0x5   :  { %p2707_p0 = scmp.ne.s32.totalorder %s28_s14, %s2706_s15  ;;  %p2712_p2 = scmp.lt.s32.totalorder %s2706_s15, %s2706_s15 }
   0x7   :  { %p2713_p3 = por %p2712_p2, %p2711_p1 }
   0x9   :  { %p2714_p4 = pnand %p2713_p3, %p2707_p0 }
   0xb   :  { %2717 = shalt.err (!%p2714_p4)
}
   0xc   :  { %s2765_s16 = smov 128   ;;  %s2766_s17 = smov 8  }
   0xd   :  { %33 = dma.hbm_to_vmem [thread:$0]  %s3324_s2, 256, %s28_s14, [#allocation3], %s2765_s16, %s2765_s16, %s2766_s17  }
   0xe   :  { %s2767_s20 = smov [#allocation5]  }
   0xf   :  { %s48_s21 = sshll.u32 %s2767_s20, 4  ;;  %s49_s21 = int_to_ptr.vmem [resolvable:$true] %s48_s21 }
  0x10   :  { %s2726_s22 = scalar_lea.vmem %s49_s21, 16  ;;  %s2730_s23 = scalar_lea.vmem %s49_s21, 32 }
  0x11   :  { %p2727_p5 = scmp.ne.s32.totalorder %s49_s21, %s2726_s22  ;;  %p2731_p6 = scmp.lt.s32.totalorder %s49_s21, %s49_s21 }
  0x12   :  { %p2732_p7 = scmp.lt.s32.totalorder %s2730_s23, %s2726_s22 }
  0x14   :  { %p2733_p8 = por %p2732_p7, %p2731_p6 }
  0x16   :  { %p2734_p9 = pnand %p2733_p8, %p2727_p5 }
  0x18   :  { %2737 = shalt.err (!%p2734_p9)
}
  0x19   :  { %51 = dma.hbm_to_vmem [thread:$0]  %s3329_s7, 16, %s49_s21, [#allocation6]  }
  0x1a   :  { %2758 = dma.done.wait [#allocation3], 256  }
  0x1b   :  { %2759 = vsyncadd [#allocation3], 4294967040 }
  0x1c   :  { %2760 = dma.done.wait [#allocation6], 16  }
  0x1d   :  { %2761 = vsyncadd [#allocation6], 4294967280  ;;  %v2768_v0 = vmov 0.0   ;;  %vm2769_vm0 = vmmov 0   ;;  %v69_v1 = vld [vmem:[#allocation2 + $0x8] sm:$0xff]  ;;  %v2843_v2 = vld [vmem:[%s3325_s3 + $0x18] sm:$0xff] }
  0x1e   :  { %2347 = vmatprep.subr.mxu1 %v2768_v0  ;;  %2355 = vmatprep.mubr.msk.f32.mxu1 %vm2769_vm0, %v2768_v0  ;;  %v68_v3 = vld [vmem:[#allocation2] sm:$0xff]  ;;  %v2849_v4 = vld [vmem:[%s3325_s3 + $0x10] sm:$0xff]  ;;  %vm81_vm1 = vcmask 130048   ;;  %v65_v6 = vld [vmem:[%s3322_s0 + $0x8] sm:$0xff]  ;;  %s2770_s17 = smov 64   ;;  %vm179_vm2 = vcmask 261120  }
  0x1f   :  { %2337 = vmatprep.subr.mxu0 %v69_v1  ;;  %2348 = vmatpush3.msra.mxu1 %v2843_v2  ;;  %v64_v5 = vld [vmem:[%s3322_s0] sm:$0xff]  ;;  %v2862_v7 = vld [vmem:[%s3325_s3 + $0x8] sm:$0xff]  ;;  %v66_v26 = vld [vmem:[%s3322_s0 + $0x10] sm:$0xff]  ;;  %vm1014_vm3 = vcmask 1043456  }
  0x20   :  { %2338 = vmatpush3.msra.mxu0 %v69_v1  ;;  %2349 = vmatprep.subr.mxu1 %v2768_v0  ;;  %v2870_v8 = vld [vmem:[%s3325_s3] sm:$0xff]  ;;  %v67_v27 = vld [vmem:[%s3322_s0 + $0x18] sm:$0xff] }
  0x21   :  { %2339 = vmatprep.subr.mxu0 %v68_v3  ;;  %2350 = vmatpush3.msra.mxu1 %v2849_v4  ;;  %v2901_v10 = vld [vmem:[%s3326_s4] ss:$0 sm:$0xff]  ;;  %s2771_s4 = smov 32  }
  0x22   :  { %2340 = vmatpush3.msra.mxu0 %v68_v3  ;;  %2341 = vmatprep.mubr.msk.f32.mxu0 %vm81_vm1, %v64_v5 }
  0x23   :  { %2351 = vmatprep.subr.mxu1 %v2768_v0  ;;  %2342 = vmatmul.mubr.msk.f32.vlgmr.msra.gmra.mxu0 %vm81_vm1, %v65_v6 }
  0x24   :  { %2352 = vmatpush3.msra.mxu1 %v2862_v7  ;;  %2358 = vmatprep.subr.mxu0 %v2768_v0 }
  0x25   :  { %2353 = vmatprep.subr.mxu1 %v2768_v0  ;;  %2359 = vmatpush3.msra.mxu0 %v2843_v2 }
  0x26   :  { %2354 = vmatpush3.msra.mxu1 %v2870_v8  ;;  %2360 = vmatprep.subr.mxu0 %v2768_v0 }
  0x27   :  { %2356 = vmatmul.mubr.f32.vlgmr.msra.gmra.mxu1 %v2768_v0  ;;  %2361 = vmatpush3.msra.mxu0 %v2849_v4 }
  0x28   :  { %2362 = vmatprep.subr.mxu0 %v2768_v0  ;;  %2369 = vmatprep.subr.mxu1 %v2768_v0 }
  0x29   :  { %2363 = vmatpush3.msra.mxu0 %v2862_v7  ;;  %2370 = vmatpush3.msra.mxu1 %v2843_v2 }
  0x2a   :  { %2364 = vmatprep.subr.mxu0 %v2768_v0  ;;  %2371 = vmatprep.subr.mxu1 %v2768_v0 }
  0x2b   :  { %2365 = vmatpush3.msra.mxu0 %v2870_v8  ;;  %2372 = vmatpush3.msra.mxu1 %v2849_v4 }
  0x2c   :  { %2373 = vmatprep.subr.mxu1 %v2768_v0  ;;  %2377 = vmatprep.mubr.msk.f32.mxu1 %vm2769_vm0, %v2768_v0 }
  0x2d   :  { %2374 = vmatpush3.msra.mxu1 %v2862_v7  ;;  %2380 = vmatprep.subr.mxu0 %v2768_v0 }
  0x2e   :  { %2375 = vmatprep.subr.mxu1 %v2768_v0  ;;  %2344 = vmatprep.mubr.msk.f32.mxu0 %vm81_vm1, %v66_v26 }
  0x2f   :  { %2376 = vmatpush3.msra.mxu1 %v2870_v8  ;;  %2345 = vmatmul.mubr.msk.f32.gmra.mxu0 %vm81_vm1, %v67_v27 }
  0x30   :  { %2391 = vmatprep.subr.mxu1 %v2768_v0  ;;  %2366 = vmatprep.mubr.msk.f32.mxu0 %vm2769_vm0, %v2768_v0 }
  0xe3   :  { %v2896_v9 = vpop.f32.mrf.mxu0 }
  0xe4   :  { %v166_v54 = vadd.f32 %v2896_v9, %v2901_v10 }
  0xe5   :  { %v160_v11 = vpop.f32.mrf.mxu0 }
  0xe6   :  { %v161_v12 = vadd.f32 %v2901_v10, %v160_v11 }
  0xe7   :  { %v249_v13 = vpop.f32.mrf.mxu1 }
  0xe8   :  { %v253_v14 = vadd.f32 %v249_v13, %v161_v12 }
  0xe9   :  { %v2357_v15 = vpop.f32.mrf.mxu1 }
  0xea   :  { %2562 = vtanh.f32 %v253_v14  ;;  %v2201_v17 = vmul.f32 -1.442695, %v253_v14 }
  0xec   :  { %2564 = vpow2.f32 %v2201_v17 }
  0xef   :  { %v2932_v32 = vpop.f32.mrf.mxu0 }
  0xf1   :  { %v2934_v33 = vpop.f32.mrf.mxu0 }
  0xf7   :  { %v2563_v16 = vpop.eup %2562 }
  0xf8   :  { %263 = vrot.lane.b32.xlu0 %v2563_v16, %s2770_s17 }
  0xf9   :  { %v2565_v18 = vpop.eup %2564 }
  0xfa   :  { %v257_v19 = vadd.f32 1.0, %v2565_v18 }
  0xfc   :  { %2566 = vrcp.f32 %v257_v19 }
 0x109   :  { %v2567_v20 = vpop.eup %2566 }
 0x10a   :  { %v261_v23 = vmul.f32 0.0, %v2567_v20 }
 0x16a   :  { %v264_v21 = vpop.permute.xlu0 %263 }
 0x16b   :  { %v266_v22 = vmul.f32 %v2567_v20, %v264_v21 }
 0x16d   :  { %268 = vrot.lane.b32.xlu0 %v266_v22, %s2771_s4 }
 0x1df   :  { %v269_v24 = vpop.permute.xlu0 %268 }
 0x1e0   :  { %v271_v25 = vadd.f32 %v269_v24, %v261_v23 }
 0x1e2   :  { %2568 = vtanh.f32 %v271_v25  ;;  %v365_v45 = vrot.slane %v271_v25, 4 }
 0x1ef   :  { %v2569_v28 = vpop.eup %2568 }
 0x1f0   :  { %274 = vrot.lane.b32.xlu1 %v2569_v28, %s2770_s17 }
 0x262   :  { %v275_v29 = vpop.permute.xlu1 %274 }
 0x263   :  { %v2917_v30 = vmul.f32 %v2567_v20, %v275_v29 }
 0x265   :  { %279 = vrot.lane.b32.xlu1 %v2917_v30, %s2771_s4 }
 0x2d7   :  { %v280_v31 = vpop.permute.xlu1 %279 }
 0x2d8   :  { %2367 = vmatmul.mubr.msk.f32.vlgmr.msra.gmra.mxu0 %vm179_vm2, %v280_v31 }
 0x2d9   :  { %2381 = vmatpush3.msra.mxu0 %v2843_v2  ;;  %2388 = vmatprep.mubr.msk.f32.mxu0 %vm2769_vm0, %v2768_v0 }
 0x2da   :  { %2382 = vmatprep.subr.mxu0 %v2768_v0 }
 0x2db   :  { %2383 = vmatpush3.msra.mxu0 %v2849_v4 }
 0x2dc   :  { %2384 = vmatprep.subr.mxu0 %v2768_v0 }
 0x2dd   :  { %2385 = vmatpush3.msra.mxu0 %v2862_v7 }
 0x2de   :  { %2386 = vmatprep.subr.mxu0 %v2768_v0 }
 0x2df   :  { %2387 = vmatpush3.msra.mxu0 %v2870_v8 }
 0x2e0   :  { %2402 = vmatprep.subr.mxu0 %v2768_v0 }
 0x398   :  { %v349_v34 = vpop.f32.mrf.mxu0 }
 0x399   :  { %v354_v35 = vrot.slane %v349_v34, 4 }
 0x39a   :  { %v2368_v36 = vpop.f32.mrf.mxu0 }
 0x39b   :  { %v356_v37 = vadd.f32 %v354_v35, %v161_v12 }
 0x39d   :  { %2570 = vtanh.f32 %v356_v37  ;;  %v2203_v39 = vmul.f32 -1.442695, %v356_v37 }
 0x39f   :  { %2572 = vpow2.f32 %v2203_v39 }
 0x3aa   :  { %v2571_v38 = vpop.eup %2570 }
 0x3ab   :  { %369 = vrot.lane.b32.xlu0 %v2571_v38, %s2770_s17  ;;  %v171_v38 = vadd.f32 %v2901_v10, %v2934_v33 }
 0x3ac   :  { %v2573_v40 = vpop.eup %2572 }
 0x3ad   :  { %v360_v41 = vadd.f32 1.0, %v2573_v40 }
 0x3af   :  { %2574 = vrcp.f32 %v360_v41 }
 0x3bc   :  { %v2575_v42 = vpop.eup %2574 }
 0x3bd   :  { %v367_v46 = vmul.f32 %v2575_v42, %v365_v45 }
 0x41d   :  { %v370_v43 = vpop.permute.xlu0 %369 }
 0x41e   :  { %v372_v44 = vmul.f32 %v2575_v42, %v370_v43 }
 0x420   :  { %374 = vrot.lane.b32.xlu1 %v372_v44, %s2771_s4 }
 0x492   :  { %v375_v47 = vpop.permute.xlu1 %374 }
 0x493   :  { %v377_v48 = vadd.f32 %v375_v47, %v367_v46 }
 0x495   :  { %2576 = vtanh.f32 %v377_v48  ;;  %v469_v3 = vrot.slane %v377_v48, 4 }
 0x4a2   :  { %v2577_v49 = vpop.eup %2576 }
 0x4a3   :  { %380 = vrot.lane.b32.xlu0 %v2577_v49, %s2770_s17 }
 0x515   :  { %v381_v50 = vpop.permute.xlu0 %380 }
 0x516   :  { %v2939_v51 = vmul.f32 %v2575_v42, %v381_v50 }
 0x518   :  { %v385_v52 = vrot.slane %v2939_v51, 4 }
 0x51a   :  { %386 = vrot.lane.b32.xlu1 %v385_v52, %s2771_s4 }
 0x58c   :  { %v387_v53 = vpop.permute.xlu1 %386 }
 0x58d   :  { %2378 = vmatmul.mubr.msk.f32.vlgmr.msra.gmra.mxu1 %vm179_vm2, %v387_v53 }
 0x58e   :  { %2392 = vmatpush3.msra.mxu1 %v2843_v2  ;;  %2399 = vmatprep.mubr.msk.f32.mxu1 %vm2769_vm0, %v2768_v0 }
 0x58f   :  { %2393 = vmatprep.subr.mxu1 %v2768_v0 }
 0x590   :  { %2394 = vmatpush3.msra.mxu1 %v2849_v4 }
 0x591   :  { %2395 = vmatprep.subr.mxu1 %v2768_v0 }
 0x592   :  { %2396 = vmatpush3.msra.mxu1 %v2862_v7 }
 0x593   :  { %2397 = vmatprep.subr.mxu1 %v2768_v0 }
 0x594   :  { %2398 = vmatpush3.msra.mxu1 %v2870_v8 }
 0x595   :  { %2413 = vmatprep.subr.mxu1 %v2768_v0 }
 0x64d   :  { %v456_v55 = vpop.f32.mrf.mxu1 }
 0x64e   :  { %v460_v56 = vadd.f32 %v456_v55, %v166_v54 }
 0x64f   :  { %v2379_v57 = vpop.f32.mrf.mxu1 }
 0x650   :  { %2578 = vtanh.f32 %v460_v56  ;;  %v2205_v59 = vmul.f32 -1.442695, %v460_v56 }
 0x652   :  { %2580 = vpow2.f32 %v2205_v59 }
 0x65d   :  { %v2579_v58 = vpop.eup %2578 }
 0x65e   :  { %473 = vrot.lane.b32.xlu0 %v2579_v58, %s2770_s17 }
 0x65f   :  { %v2581_v60 = vpop.eup %2580 }
 0x660   :  { %v464_v61 = vadd.f32 1.0, %v2581_v60 }
 0x662   :  { %2582 = vrcp.f32 %v464_v61 }
 0x66f   :  { %v2583_v62 = vpop.eup %2582 }
 0x670   :  { %v471_v5 = vmul.f32 %v2583_v62, %v469_v3 }
 0x6d0   :  { %v474_v63 = vpop.permute.xlu0 %473 }
 0x6d1   :  { %v476_v1 = vmul.f32 %v2583_v62, %v474_v63 }
 0x6d3   :  { %478 = vrot.lane.b32.xlu1 %v476_v1, %s2771_s4 }
 0x745   :  { %v479_v6 = vpop.permute.xlu1 %478 }
 0x746   :  { %v481_v9 = vadd.f32 %v479_v6, %v471_v5 }
 0x748   :  { %2584 = vtanh.f32 %v481_v9  ;;  %v575_v26 = vrot.slane %v481_v9, 4 }
 0x755   :  { %v2585_v11 = vpop.eup %2584 }
 0x756   :  { %484 = vrot.lane.b32.xlu0 %v2585_v11, %s2770_s17 }
 0x7c8   :  { %v485_v12 = vpop.permute.xlu0 %484 }
 0x7c9   :  { %v2959_v13 = vmul.f32 %v2583_v62, %v485_v12 }
 0x7cb   :  { %489 = vrot.lane.b32.xlu1 %v2959_v13, %s2771_s4 }
 0x83d   :  { %v490_v14 = vpop.permute.xlu1 %489 }
 0x83e   :  { %2389 = vmatmul.mubr.msk.f32.vlgmr.msra.gmra.mxu0 %vm179_vm2, %v490_v14 }
 0x83f   :  { %2403 = vmatpush3.msra.mxu0 %v2843_v2  ;;  %2410 = vmatprep.mubr.msk.f32.mxu0 %vm2769_vm0, %v2768_v0 }
 0x840   :  { %2404 = vmatprep.subr.mxu0 %v2768_v0 }
 0x841   :  { %2405 = vmatpush3.msra.mxu0 %v2849_v4 }
 0x842   :  { %2406 = vmatprep.subr.mxu0 %v2768_v0 }
 0x843   :  { %2407 = vmatpush3.msra.mxu0 %v2862_v7 }
 0x844   :  { %2408 = vmatprep.subr.mxu0 %v2768_v0 }
 0x845   :  { %2409 = vmatpush3.msra.mxu0 %v2870_v8 }
 0x846   :  { %2424 = vmatprep.subr.mxu0 %v2768_v0 }
 0x8fe   :  { %v559_v15 = vpop.f32.mrf.mxu0 }
 0x8ff   :  { %v564_v16 = vrot.slane %v559_v15, 4 }
 0x900   :  { %v2390_v17 = vpop.f32.mrf.mxu0 }
 0x901   :  { %v566_v18 = vadd.f32 %v564_v16, %v166_v54  ;;  %v3021_v16 = vadd.f32 %v2932_v32, %v2901_v10 }
 0x903   :  { %2586 = vtanh.f32 %v566_v18  ;;  %v2207_v20 = vmul.f32 -1.442695, %v566_v18 }
 0x905   :  { %2588 = vpow2.f32 %v2207_v20 }
 0x910   :  { %v2587_v19 = vpop.eup %2586 }
 0x911   :  { %579 = vrot.lane.b32.xlu0 %v2587_v19, %s2770_s17 }
 0x912   :  { %v2589_v21 = vpop.eup %2588 }
 0x913   :  { %v570_v22 = vadd.f32 1.0, %v2589_v21 }
 0x915   :  { %2590 = vrcp.f32 %v570_v22 }
 0x922   :  { %v2591_v23 = vpop.eup %2590 }
 0x923   :  { %v577_v27 = vmul.f32 %v2591_v23, %v575_v26 }
 0x983   :  { %v580_v24 = vpop.permute.xlu0 %579 }
 0x984   :  { %v582_v25 = vmul.f32 %v2591_v23, %v580_v24 }
 0x986   :  { %584 = vrot.lane.b32.xlu1 %v582_v25, %s2771_s4 }
 0x9f8   :  { %v585_v28 = vpop.permute.xlu1 %584 }
 0x9f9   :  { %v587_v29 = vadd.f32 %v585_v28, %v577_v27 }
 0x9fb   :  { %2592 = vtanh.f32 %v587_v29  ;;  %v679_v49 = vrot.slane %v587_v29, 4  ;;  %v1022_v29 = vld [vmem:[%s3327_s5 + $0x18] sm:$0xff] }
 0xa08   :  { %v2593_v31 = vpop.eup %2592 }
 0xa09   :  { %590 = vrot.lane.b32.xlu0 %v2593_v31, %s2770_s17  ;;  %v1021_v31 = vld [vmem:[%s3327_s5 + $0x10] sm:$0xff] }
 0xa7b   :  { %v591_v34 = vpop.permute.xlu0 %590 }
 0xa7c   :  { %v2977_v35 = vmul.f32 %v2591_v23, %v591_v34 }
 0xa7e   :  { %v595_v36 = vrot.slane %v2977_v35, 4 }
 0xa80   :  { %596 = vrot.lane.b32.xlu1 %v595_v36, %s2771_s4  ;;  %v1015_v36 = vsel %vm1014_vm3, %v2917_v30, %v2939_v51  ;;  %v1016_v51 = vsel %vm1014_vm3, %v2959_v13, %v2977_v35  ;;  %v3074_v13 = vld [vmem:[%s3328_s6 + $0x8] sm:$0xff] }
 0xaf2   :  { %v597_v37 = vpop.permute.xlu1 %596 }
 0xaf3   :  { %2400 = vmatmul.mubr.msk.f32.vlgmr.msra.gmra.mxu1 %vm179_vm2, %v597_v37  ;;  %v1020_v37 = vld [vmem:[%s3327_s5 + $0x8] sm:$0xff] }
 0xaf4   :  { %2414 = vmatpush3.msra.mxu1 %v2843_v2  ;;  %2421 = vmatprep.mubr.msk.f32.mxu1 %vm2769_vm0, %v2768_v0 }
 0xaf5   :  { %2415 = vmatprep.subr.mxu1 %v2768_v0 }
 0xaf6   :  { %2416 = vmatpush3.msra.mxu1 %v2849_v4 }
 0xaf7   :  { %2417 = vmatprep.subr.mxu1 %v2768_v0 }
 0xaf8   :  { %2418 = vmatpush3.msra.mxu1 %v2862_v7 }
 0xaf9   :  { %2419 = vmatprep.subr.mxu1 %v2768_v0 }
 0xafa   :  { %2420 = vmatpush3.msra.mxu1 %v2870_v8 }
 0xafb   :  { %2435 = vmatprep.subr.mxu1 %v1022_v29 }
 0xbb3   :  { %v666_v39 = vpop.f32.mrf.mxu1 }
 0xbb4   :  { %v670_v40 = vadd.f32 %v666_v39, %v171_v38 }
 0xbb5   :  { %v2401_v41 = vpop.f32.mrf.mxu1 }
 0xbb6   :  { %2594 = vtanh.f32 %v670_v40  ;;  %v2209_v43 = vmul.f32 -1.442695, %v670_v40  ;;  %v3059_v41 = vld [vmem:[%s3328_s6 + $0x18] sm:$0xff] }
 0xbb8   :  { %2596 = vpow2.f32 %v2209_v43  ;;  %v3065_v43 = vld [vmem:[%s3328_s6 + $0x10] sm:$0xff] }
 0xbc3   :  { %v2595_v42 = vpop.eup %2594 }
 0xbc4   :  { %683 = vrot.lane.b32.xlu0 %v2595_v42, %s2770_s17 }
 0xbc5   :  { %v2597_v44 = vpop.eup %2596 }
 0xbc6   :  { %v674_v45 = vadd.f32 1.0, %v2597_v44  ;;  %v3082_v44 = vld [vmem:[%s3328_s6] sm:$0xff] }
 0xbc8   :  { %2598 = vrcp.f32 %v674_v45 }
 0xbd5   :  { %v2599_v46 = vpop.eup %2598 }
 0xbd6   :  { %v681_v50 = vmul.f32 %v2599_v46, %v679_v49 }
 0xc36   :  { %v684_v47 = vpop.permute.xlu0 %683 }
 0xc37   :  { %v686_v48 = vmul.f32 %v2599_v46, %v684_v47 }
 0xc39   :  { %688 = vrot.lane.b32.xlu1 %v686_v48, %s2771_s4 }
 0xcab   :  { %v689_v33 = vpop.permute.xlu1 %688 }
 0xcac   :  { %v691_v52 = vadd.f32 %v689_v33, %v681_v50  ;;  %v3110_v50 = vld [vmem:[#allocation5] ss:$0 sm:$0xff] }
 0xcae   :  { %2600 = vtanh.f32 %v691_v52 }
 0xcbb   :  { %v2601_v53 = vpop.eup %2600 }
 0xcbc   :  { %694 = vrot.lane.b32.xlu0 %v2601_v53, %s2770_s17 }
 0xd2e   :  { %v695_v54 = vpop.permute.xlu0 %694 }
 0xd2f   :  { %v2996_v55 = vmul.f32 %v2599_v46, %v695_v54 }
 0xd31   :  { %699 = vrot.lane.b32.xlu1 %v2996_v55, %s2771_s4 }
 0xda3   :  { %v700_v56 = vpop.permute.xlu1 %699 }
 0xda4   :  { %2411 = vmatmul.mubr.msk.f32.vlgmr.msra.gmra.mxu0 %vm179_vm2, %v700_v56 }
 0xda5   :  { %2425 = vmatpush3.msra.mxu0 %v2843_v2  ;;  %2432 = vmatprep.mubr.msk.f32.mxu0 %vm2769_vm0, %v2768_v0 }
 0xda6   :  { %2426 = vmatprep.subr.mxu0 %v2768_v0 }
 0xda7   :  { %2427 = vmatpush3.msra.mxu0 %v2849_v4 }
 0xda8   :  { %2428 = vmatprep.subr.mxu0 %v2768_v0 }
 0xda9   :  { %2429 = vmatpush3.msra.mxu0 %v2862_v7 }
 0xdaa   :  { %2430 = vmatprep.subr.mxu0 %v2768_v0 }
 0xdab   :  { %2431 = vmatpush3.msra.mxu0 %v2870_v8  ;;  %v785_v8 = vrot.slane %v691_v52, 4 }
 0xdac   :  { %2449 = vmatprep.subr.mxu0 %v2768_v0 }
 0xe64   :  { %v769_v57 = vpop.f32.mrf.mxu0 }
 0xe65   :  { %v774_v58 = vrot.slane %v769_v57, 4 }
 0xe66   :  { %v2412_v2 = vpop.f32.mrf.mxu0 }
 0xe67   :  { %v776_v59 = vadd.f32 %v774_v58, %v171_v38  ;;  %v1019_v38 = vld [vmem:[%s3327_s5] sm:$0xff] }
 0xe69   :  { %2602 = vtanh.f32 %v776_v59  ;;  %v2211_v61 = vmul.f32 -1.442695, %v776_v59 }
 0xe6b   :  { %2604 = vpow2.f32 %v2211_v61 }
 0xe76   :  { %v2603_v60 = vpop.eup %2602 }
 0xe77   :  { %789 = vrot.lane.b32.xlu0 %v2603_v60, %s2770_s17 }
 0xe78   :  { %v2605_v4 = vpop.eup %2604 }
 0xe79   :  { %v780_v62 = vadd.f32 1.0, %v2605_v4 }
 0xe7b   :  { %2606 = vrcp.f32 %v780_v62 }
 0xe88   :  { %v2607_v7 = vpop.eup %2606 }
 0xe89   :  { %v787_v3 = vmul.f32 %v2607_v7, %v785_v8 }
 0xee9   :  { %v790_v63 = vpop.permute.xlu0 %789 }
 0xeea   :  { %v792_v1 = vmul.f32 %v2607_v7, %v790_v63 }
 0xeec   :  { %794 = vrot.lane.b32.xlu1 %v792_v1, %s2771_s4 }
 0xf5e   :  { %v795_v5 = vpop.permute.xlu1 %794 }
 0xf5f   :  { %v797_v6 = vadd.f32 %v795_v5, %v787_v3 }
 0xf61   :  { %2608 = vtanh.f32 %v797_v6  ;;  %v889_v10 = vrot.slane %v797_v6, 4 }
 0xf6e   :  { %v2609_v9 = vpop.eup %2608 }
 0xf6f   :  { %800 = vrot.lane.b32.xlu0 %v2609_v9, %s2770_s17 }
 0xfe1   :  { %v801_v11 = vpop.permute.xlu0 %800 }
 0xfe2   :  { %v3014_v12 = vmul.f32 %v2607_v7, %v801_v11 }
 0xfe4   :  { %v805_v14 = vrot.slane %v3014_v12, 4 }
 0xfe6   :  { %806 = vrot.lane.b32.xlu1 %v805_v14, %s2771_s4 }
0x1058   :  { %v807_v15 = vpop.permute.xlu1 %806 }
0x1059   :  { %2422 = vmatmul.mubr.msk.f32.vlgmr.msra.gmra.mxu1 %vm179_vm2, %v807_v15 }
0x105a   :  { %2436 = vmatpush3.msra.mxu1 %v1022_v29 }
0x105b   :  { %2437 = vmatprep.subr.mxu1 %v1021_v31 }
0x105c   :  { %2438 = vmatpush3.msra.mxu1 %v1021_v31 }
0x105d   :  { %2439 = vmatprep.subr.mxu1 %v1020_v37 }
0x105e   :  { %2440 = vmatpush3.msra.mxu1 %v1020_v37 }
0x105f   :  { %2441 = vmatprep.subr.mxu1 %v1019_v38 }
0x1060   :  { %2442 = vmatpush3.msra.mxu1 %v1019_v38 }
0x1061   :  { %2460 = vmatprep.subr.mxu1 %v2768_v0 }
0x1119   :  { %v876_v17 = vpop.f32.mrf.mxu1 }
0x111a   :  { %v880_v18 = vadd.f32 %v876_v17, %v3021_v16 }
0x111b   :  { %v2423_v19 = vpop.f32.mrf.mxu1 }
0x111c   :  { %2610 = vtanh.f32 %v880_v18  ;;  %v2213_v21 = vmul.f32 -1.442695, %v880_v18  ;;  %v1017_v19 = vsel %vm1014_vm3, %v2996_v55, %v3014_v12 }
0x111e   :  { %2612 = vpow2.f32 %v2213_v21 }
0x1129   :  { %v2611_v20 = vpop.eup %2610 }
0x112a   :  { %893 = vrot.lane.b32.xlu0 %v2611_v20, %s2770_s17 }
0x112b   :  { %v2613_v22 = vpop.eup %2612 }
0x112c   :  { %v884_v23 = vadd.f32 1.0, %v2613_v22 }
0x112e   :  { %2614 = vrcp.f32 %v884_v23 }
0x113b   :  { %v2615_v24 = vpop.eup %2614 }
0x113c   :  { %v891_v32 = vmul.f32 %v2615_v24, %v889_v10 }
0x119c   :  { %v894_v25 = vpop.permute.xlu0 %893 }
0x119d   :  { %v896_v26 = vmul.f32 %v2615_v24, %v894_v25 }
0x119f   :  { %898 = vrot.lane.b32.xlu1 %v896_v26, %s2771_s4 }
0x1211   :  { %v899_v27 = vpop.permute.xlu1 %898 }
0x1212   :  { %v3026_v28 = vadd.f32 %v899_v27, %v891_v32 }
0x1214   :  { %2616 = vtanh.f32 %v3026_v28  ;;  %v995_v6 = vrot.slane %v3026_v28, 4 }
0x1221   :  { %v2617_v34 = vpop.eup %2616 }
0x1222   :  { %904 = vrot.lane.b32.xlu0 %v2617_v34, %s2770_s17 }
0x1226   :  { %1038 = vrot.lane.b32.xlu0 %v1015_v36, %s2771_s4 }
0x1294   :  { %v905_v39 = vpop.permute.xlu0 %904 }
0x1295   :  { %v3047_v40 = vmul.f32 %v2615_v24, %v905_v39 }
0x1297   :  { %909 = vrot.lane.b32.xlu1 %v3047_v40, %s2771_s4 }
0x1298   :  { %v1039_v30 = vpop.permute.xlu0 %1038 }
0x1299   :  { %2443 = vmatprep.mubr.msk.f32.mxu1 %vm179_vm2, %v1039_v30 }
0x129b   :  { %1040 = vrot.lane.b32.xlu1 %v1016_v51, %s2771_s4 }
0x1309   :  { %v910_v42 = vpop.permute.xlu1 %909 }
0x130a   :  { %2433 = vmatmul.mubr.msk.f32.vlgmr.msra.gmra.mxu0 %vm179_vm2, %v910_v42 }
0x130b   :  { %2450 = vmatpush3.msra.mxu0 %v3059_v41  ;;  %2457 = vmatprep.mubr.msk.f32.mxu0 %vm2769_vm0, %v2768_v0 }
0x130c   :  { %2451 = vmatprep.subr.mxu0 %v2768_v0 }
0x130d   :  { %2452 = vmatpush3.msra.mxu0 %v3065_v43  ;;  %v1041_v35 = vpop.permute.xlu1 %1040 }
0x130e   :  { %2453 = vmatprep.subr.mxu0 %v2768_v0  ;;  %2444 = vmatmul.mubr.msk.f32.vlgmr.msra.gmra.mxu1 %vm179_vm2, %v1041_v35 }
0x130f   :  { %2454 = vmatpush3.msra.mxu0 %v3074_v13  ;;  %2461 = vmatpush3.msra.mxu1 %v3059_v41 }
0x1310   :  { %2455 = vmatprep.subr.mxu0 %v2768_v0  ;;  %2462 = vmatprep.subr.mxu1 %v2768_v0 }
0x1311   :  { %2456 = vmatpush3.msra.mxu0 %v3082_v44  ;;  %2463 = vmatpush3.msra.mxu1 %v3065_v43 }
0x1312   :  { %2458 = vmatmul.mubr.f32.vlgmr.msra.gmra.mxu0 %v2768_v0  ;;  %2464 = vmatprep.subr.mxu1 %v2768_v0 }
0x1313   :  { %2465 = vmatpush3.msra.mxu1 %v3074_v13  ;;  %2471 = vmatprep.subr.mxu0 %v2768_v0 }
0x1314   :  { %2466 = vmatprep.subr.mxu1 %v2768_v0  ;;  %2472 = vmatpush3.msra.mxu0 %v3059_v41 }
0x1315   :  { %2467 = vmatpush3.msra.mxu1 %v3082_v44  ;;  %2473 = vmatprep.subr.mxu0 %v2768_v0 }
0x1316   :  { %2474 = vmatpush3.msra.mxu0 %v3065_v43  ;;  %2479 = vmatprep.mubr.msk.f32.mxu0 %vm2769_vm0, %v2768_v0 }
0x1317   :  { %2475 = vmatprep.subr.mxu0 %v2768_v0  ;;  %2482 = vmatprep.subr.mxu1 %v2768_v0 }
0x1318   :  { %2476 = vmatpush3.msra.mxu0 %v3074_v13 }
0x1319   :  { %2477 = vmatprep.subr.mxu0 %v2768_v0 }
0x131a   :  { %2478 = vmatpush3.msra.mxu0 %v3082_v44 }
0x131b   :  { %2493 = vmatprep.subr.mxu0 %v2768_v0 }
0x13ca   :  { %v979_v45 = vpop.f32.mrf.mxu0 }
0x13cb   :  { %v984_v46 = vrot.slane %v979_v45, 4 }
0x13cc   :  { %v2434_v47 = vpop.f32.mrf.mxu0 }
0x13cd   :  { %v986_v48 = vadd.f32 %v984_v46, %v3021_v16 }
0x13ce   :  { %v3108_v49 = vpop.f32.mrf.mxu1 }
0x13cf   :  { %2618 = vtanh.f32 %v986_v48  ;;  %v2215_v2 = vmul.f32 -1.442695, %v986_v48 }
0x13d0   :  { %v1120_v33 = vpop.f32.mrf.mxu1 }
0x13d1   :  { %v3113_v52 = vadd.f32 %v3110_v50, %v1120_v33 }
0x13d2   :  { %v1205_v53 = vpop.f32.mrf.mxu0 }
0x13d3   :  { %v1209_v54 = vadd.f32 %v1205_v53, %v3113_v52  ;;  %v1126_v53 = vadd.f32 %v3108_v49, %v3110_v50 }
0x13d4   :  { %v2459_v56 = vpop.f32.mrf.mxu0 }
0x13d5   :  { %2620 = vtanh.f32 %v1209_v54  ;;  %v2221_v59 = vmul.f32 -1.442695, %v1209_v54 }
0x13d6   :  { %2622 = vpow2.f32 %v2215_v2 }
0x13d7   :  { %2624 = vpow2.f32 %v2221_v59 }
0x13dc   :  { %v2619_v57 = vpop.eup %2618 }
0x13dd   :  { %999 = vrot.lane.b32.xlu0 %v2619_v57, %s2770_s17 }
0x13e2   :  { %v2621_v58 = vpop.eup %2620 }
0x13e3   :  { %1219 = vrot.lane.b32.xlu1 %v2621_v58, %s2770_s17  ;;  %v2623_v60 = vpop.eup %2622 }
0x13e4   :  { %v990_v61 = vadd.f32 1.0, %v2623_v60  ;;  %v2625_v4 = vpop.eup %2624 }
0x13e5   :  { %v1213_v62 = vadd.f32 1.0, %v2625_v4 }
0x13e6   :  { %2626 = vrcp.f32 %v990_v61 }
0x13e7   :  { %2628 = vrcp.f32 %v1213_v62 }
0x13f3   :  { %v2627_v7 = vpop.eup %2626 }
0x13f4   :  { %v2629_v8 = vpop.eup %2628  ;;  %v997_v9 = vmul.f32 %v2627_v7, %v995_v6 }
0x13f5   :  { %v1217_v15 = vmul.f32 0.0, %v2629_v8 }
0x144f   :  { %v1000_v63 = vpop.permute.xlu0 %999 }
0x1450   :  { %v1002_v1 = vmul.f32 %v2627_v7, %v1000_v63 }
0x1452   :  { %1004 = vrot.lane.b32.xlu0 %v1002_v1, %s2771_s4 }
0x1455   :  { %v1220_v3 = vpop.permute.xlu1 %1219 }
0x1456   :  { %v1222_v5 = vmul.f32 %v2629_v8, %v1220_v3 }
0x1458   :  { %1224 = vrot.lane.b32.xlu1 %v1222_v5, %s2771_s4 }
0x14c4   :  { %v1005_v11 = vpop.permute.xlu0 %1004 }
0x14c5   :  { %v1007_v14 = vadd.f32 %v1005_v11, %v997_v9 }
0x14c7   :  { %2630 = vtanh.f32 %v1007_v14 }
0x14ca   :  { %v1225_v16 = vpop.permute.xlu1 %1224 }
0x14cb   :  { %v1227_v17 = vadd.f32 %v1225_v16, %v1217_v15 }
0x14cd   :  { %2632 = vtanh.f32 %v1227_v17  ;;  %v1328_v51 = vrot.slane %v1227_v17, 4 }
0x14d4   :  { %v2631_v18 = vpop.eup %2630 }
0x14d5   :  { %1010 = vrot.lane.b32.xlu0 %v2631_v18, %s2770_s17 }
0x14d9   :  { %1042 = vrot.lane.b32.xlu0 %v1017_v19, %s2771_s4 }
0x14da   :  { %v2633_v20 = vpop.eup %2632 }
0x14db   :  { %1230 = vrot.lane.b32.xlu1 %v2633_v20, %s2770_s17 }
0x1547   :  { %v1011_v21 = vpop.permute.xlu0 %1010 }
0x1548   :  { %v1013_v22 = vmul.f32 %v2627_v7, %v1011_v21 }
0x154a   :  { %v1018_v23 = vsel %vm1014_vm3, %v3047_v40, %v1013_v22 }
0x154b   :  { %v1043_v24 = vpop.permute.xlu0 %1042  ;;  %1044 = vrot.lane.b32.xlu1 %v1018_v23, %s2771_s4 }
0x154c   :  { %2446 = vmatprep.mubr.msk.f32.mxu1 %vm179_vm2, %v1043_v24 }
0x154d   :  { %v1231_v25 = vpop.permute.xlu1 %1230 }
0x154e   :  { %v3131_v26 = vmul.f32 %v2629_v8, %v1231_v25 }
0x1550   :  { %1242 = vrot.lane.b32.xlu0 %v3131_v26, %s2771_s4 }
0x15bd   :  { %v1045_v55 = vpop.permute.xlu1 %1044 }
0x15be   :  { %2447 = vmatmul.mubr.msk.f32.gmra.mxu1 %vm179_vm2, %v1045_v55 }
0x15bf   :  { %2468 = vmatprep.mubr.msk.f32.mxu1 %vm2769_vm0, %v2768_v0 }
0x15c2   :  { %v1243_v12 = vpop.permute.xlu0 %1242 }
0x15c3   :  { %2469 = vmatmul.mubr.msk.f32.vlgmr.msra.gmra.mxu1 %vm179_vm2, %v1243_v12 }
0x15c4   :  { %2483 = vmatpush3.msra.mxu1 %v3059_v41  ;;  %2490 = vmatprep.mubr.msk.f32.mxu1 %vm2769_vm0, %v2768_v0 }
0x15c5   :  { %2484 = vmatprep.subr.mxu1 %v2768_v0 }
0x15c6   :  { %2485 = vmatpush3.msra.mxu1 %v3065_v43 }
0x15c7   :  { %2486 = vmatprep.subr.mxu1 %v2768_v0 }
0x15c8   :  { %2487 = vmatpush3.msra.mxu1 %v3074_v13 }
0x15c9   :  { %2488 = vmatprep.subr.mxu1 %v2768_v0 }
0x15ca   :  { %2489 = vmatpush3.msra.mxu1 %v3082_v44 }
0x15cb   :  { %2504 = vmatprep.subr.mxu1 %v2768_v0 }
0x167e   :  { %v3149_v10 = vpop.f32.mrf.mxu1 }
0x1680   :  { %v3151_v32 = vpop.f32.mrf.mxu1 }
0x1683   :  { %v1312_v27 = vpop.f32.mrf.mxu1 }
0x1684   :  { %v1317_v28 = vrot.slane %v1312_v27, 4 }
0x1685   :  { %v2470_v29 = vpop.f32.mrf.mxu1 }
0x1686   :  { %v1319_v31 = vadd.f32 %v1317_v28, %v3113_v52 }
0x1688   :  { %2634 = vtanh.f32 %v1319_v31  ;;  %v2223_v36 = vmul.f32 -1.442695, %v1319_v31 }
0x168a   :  { %2636 = vpow2.f32 %v2223_v36 }
0x1695   :  { %v2635_v34 = vpop.eup %2634 }
0x1696   :  { %1332 = vrot.lane.b32.xlu1 %v2635_v34, %s2770_s17  ;;  %v1131_v34 = vadd.f32 %v3110_v50, %v3151_v32 }
0x1697   :  { %v2637_v37 = vpop.eup %2636 }
0x1698   :  { %v1323_v38 = vadd.f32 1.0, %v2637_v37 }
0x169a   :  { %2638 = vrcp.f32 %v1323_v38 }
0x16a7   :  { %v2639_v39 = vpop.eup %2638 }
0x16a8   :  { %v1330_v42 = vmul.f32 %v2639_v39, %v1328_v51 }
0x1708   :  { %v1333_v40 = vpop.permute.xlu1 %1332 }
0x1709   :  { %v1335_v30 = vmul.f32 %v2639_v39, %v1333_v40 }
0x170b   :  { %1337 = vrot.lane.b32.xlu0 %v1335_v30, %s2771_s4 }
0x177d   :  { %v1338_v35 = vpop.permute.xlu0 %1337 }
0x177e   :  { %v1340_v45 = vadd.f32 %v1338_v35, %v1330_v42 }
0x1780   :  { %2640 = vtanh.f32 %v1340_v45  ;;  %v1444_v7 = vrot.slane %v1340_v45, 4 }
0x178d   :  { %v2641_v46 = vpop.eup %2640 }
0x178e   :  { %1343 = vrot.lane.b32.xlu1 %v2641_v46, %s2770_s17 }
0x1800   :  { %v1344_v47 = vpop.permute.xlu1 %1343 }
0x1801   :  { %v1346_v48 = vmul.f32 %v2639_v39, %v1344_v47 }
0x1803   :  { %v1354_v33 = vrot.slane %v1346_v48, 4 }
0x1805   :  { %1355 = vrot.lane.b32.xlu0 %v1354_v33, %s2771_s4 }
0x1877   :  { %v3158_v52 = vpop.permute.xlu0 %1355 }
0x1878   :  { %2480 = vmatmul.mubr.msk.f32.vlgmr.msra.gmra.mxu0 %vm179_vm2, %v3158_v52 }
0x1879   :  { %2494 = vmatpush3.msra.mxu0 %v3059_v41  ;;  %2501 = vmatprep.mubr.msk.f32.mxu0 %vm2769_vm0, %v2768_v0 }
0x187a   :  { %2495 = vmatprep.subr.mxu0 %v2768_v0 }
0x187b   :  { %2496 = vmatpush3.msra.mxu0 %v3065_v43 }
0x187c   :  { %2497 = vmatprep.subr.mxu0 %v2768_v0 }
0x187d   :  { %2498 = vmatpush3.msra.mxu0 %v3074_v13 }
0x187e   :  { %2499 = vmatprep.subr.mxu0 %v2768_v0 }
0x187f   :  { %2500 = vmatpush3.msra.mxu0 %v3082_v44 }
0x1880   :  { %2515 = vmatprep.subr.mxu0 %v2768_v0 }
0x1938   :  { %v1431_v54 = vpop.f32.mrf.mxu0 }
0x1939   :  { %v1435_v56 = vadd.f32 %v1431_v54, %v1126_v53 }
0x193a   :  { %v2481_v57 = vpop.f32.mrf.mxu0 }
0x193b   :  { %2642 = vtanh.f32 %v1435_v56  ;;  %v2225_v2 = vmul.f32 -1.442695, %v1435_v56 }
0x193d   :  { %2644 = vpow2.f32 %v2225_v2 }
0x1948   :  { %v2643_v58 = vpop.eup %2642 }
0x1949   :  { %1448 = vrot.lane.b32.xlu1 %v2643_v58, %s2770_s17 }
0x194a   :  { %v2645_v59 = vpop.eup %2644 }
0x194b   :  { %v1439_v60 = vadd.f32 1.0, %v2645_v59 }
0x194d   :  { %2646 = vrcp.f32 %v1439_v60 }
0x195a   :  { %v2647_v61 = vpop.eup %2646 }
0x195b   :  { %v1446_v63 = vmul.f32 %v2647_v61, %v1444_v7 }
0x19bb   :  { %v1449_v4 = vpop.permute.xlu1 %1448 }
0x19bc   :  { %v1451_v62 = vmul.f32 %v2647_v61, %v1449_v4 }
0x19be   :  { %1453 = vrot.lane.b32.xlu0 %v1451_v62, %s2771_s4 }
0x1a30   :  { %v1454_v49 = vpop.permute.xlu0 %1453 }
0x1a31   :  { %v1456_v1 = vadd.f32 %v1454_v49, %v1446_v63 }
0x1a33   :  { %2648 = vtanh.f32 %v1456_v1  ;;  %v1561_v23 = vrot.slane %v1456_v1, 4 }
0x1a40   :  { %v2649_v8 = vpop.eup %2648 }
0x1a41   :  { %1459 = vrot.lane.b32.xlu1 %v2649_v8, %s2770_s17 }
0x1ab3   :  { %v1460_v3 = vpop.permute.xlu1 %1459 }
0x1ab4   :  { %v3177_v5 = vmul.f32 %v2647_v61, %v1460_v3 }
0x1ab6   :  { %1475 = vrot.lane.b32.xlu0 %v3177_v5, %s2771_s4 }
0x1b28   :  { %v1476_v6 = vpop.permute.xlu0 %1475 }
0x1b29   :  { %2491 = vmatmul.mubr.msk.f32.vlgmr.msra.gmra.mxu1 %vm179_vm2, %v1476_v6 }
0x1b2a   :  { %2505 = vmatpush3.msra.mxu1 %v3059_v41  ;;  %2512 = vmatprep.mubr.msk.f32.mxu1 %vm2769_vm0, %v2768_v0 }
0x1b2b   :  { %2506 = vmatprep.subr.mxu1 %v2768_v0 }
0x1b2c   :  { %2507 = vmatpush3.msra.mxu1 %v3065_v43 }
0x1b2d   :  { %2508 = vmatprep.subr.mxu1 %v2768_v0 }
0x1b2e   :  { %2509 = vmatpush3.msra.mxu1 %v3074_v13 }
0x1b2f   :  { %2510 = vmatprep.subr.mxu1 %v2768_v0 }
0x1b30   :  { %2511 = vmatpush3.msra.mxu1 %v3082_v44 }
0x1b31   :  { %2526 = vmatprep.subr.mxu1 %v2768_v0 }
0x1be9   :  { %v1545_v9 = vpop.f32.mrf.mxu1 }
0x1bea   :  { %v1550_v11 = vrot.slane %v1545_v9, 4 }
0x1beb   :  { %v2492_v14 = vpop.f32.mrf.mxu1 }
0x1bec   :  { %v1552_v15 = vadd.f32 %v1550_v11, %v1126_v53  ;;  %v3241_v11 = vadd.f32 %v3149_v10, %v3110_v50  ;;  %v2772_v50 = vmov 0  }
0x1bed   :  { %2560 = vset.pattern.permute.xlu1 %v2772_v50  ;;  %2561 = vset.pattern.permute.xlu0 %v2772_v50 }
0x1bee   :  { %2650 = vtanh.f32 %v1552_v15  ;;  %v2227_v17 = vmul.f32 -1.442695, %v1552_v15 }
0x1bf0   :  { %2652 = vpow2.f32 %v2227_v17 }
0x1bfb   :  { %v2651_v16 = vpop.eup %2650 }
0x1bfc   :  { %1565 = vrot.lane.b32.xlu1 %v2651_v16, %s2770_s17 }
0x1bfd   :  { %v2653_v18 = vpop.eup %2652 }
0x1bfe   :  { %v1556_v19 = vadd.f32 1.0, %v2653_v18 }
0x1c00   :  { %2654 = vrcp.f32 %v1556_v19 }
0x1c0d   :  { %v2655_v20 = vpop.eup %2654 }
0x1c0e   :  { %v1563_v24 = vmul.f32 %v2655_v20, %v1561_v23 }
0x1c6e   :  { %v1566_v21 = vpop.permute.xlu1 %1565 }
0x1c6f   :  { %v1568_v22 = vmul.f32 %v2655_v20, %v1566_v21 }
0x1c71   :  { %1570 = vrot.lane.b32.xlu0 %v1568_v22, %s2771_s4 }
0x1ce3   :  { %v1571_v25 = vpop.permute.xlu0 %1570 }
0x1ce4   :  { %v1573_v55 = vadd.f32 %v1571_v25, %v1563_v24 }
0x1ce6   :  { %2656 = vtanh.f32 %v1573_v55  ;;  %v1677_v46 = vrot.slane %v1573_v55, 4 }
0x1cf3   :  { %v2657_v12 = vpop.eup %2656 }
0x1cf4   :  { %1576 = vrot.lane.b32.xlu1 %v2657_v12, %s2770_s17  ;;  %v62_v12 = vld [vmem:[%s3323_s1] sm:$0xf]  ;;  %s2773_s1 = smov 96  }
0x1d66   :  { %v1577_v27 = vpop.permute.xlu1 %1576 }
0x1d67   :  { %v1579_v28 = vmul.f32 %v2655_v20, %v1577_v27  ;;  %v3254_v27 = vadd.s32 4294967295, %v62_v12 }
0x1d69   :  { %v1587_v29 = vrot.slane %v1579_v28, 4  ;;  %vm1234_vm4 = vcmp.eq.s32.totalorder %v3254_v27, 0  ;;  %vm1347_vm5 = vcmp.eq.s32.totalorder %v3254_v27, 1  ;;  %vm1463_vm7 = vcmp.eq.s32.totalorder %v3254_v27, 2 }
0x1d6a   :  { %vm1580_vm8 = vcmp.eq.s32.totalorder %v3254_v27, 3  ;;  %vm1696_vm11 = vcmp.eq.s32.totalorder %v3254_v27, 4  ;;  %vm1813_vm13 = vcmp.eq.s32.totalorder %v3254_v27, 5  ;;  %vm1929_vm14 = vcmp.eq.s32.totalorder %v3254_v27, 6 }
0x1d6b   :  { %1588 = vrot.lane.b32.xlu0 %v1587_v29, %s2771_s4  ;;  %v1235_v29 = vsel %vm1234_vm4, 1, %v2772_v50 }
0x1ddd   :  { %v3196_v31 = vpop.permute.xlu0 %1588 }
0x1dde   :  { %2502 = vmatmul.mubr.msk.f32.vlgmr.msra.gmra.mxu0 %vm179_vm2, %v3196_v31 }
0x1ddf   :  { %2516 = vmatpush3.msra.mxu0 %v3059_v41  ;;  %2523 = vmatprep.mubr.msk.f32.mxu0 %vm2769_vm0, %v2768_v0 }
0x1de0   :  { %2517 = vmatprep.subr.mxu0 %v2768_v0 }
0x1de1   :  { %2518 = vmatpush3.msra.mxu0 %v3065_v43 }
0x1de2   :  { %2519 = vmatprep.subr.mxu0 %v2768_v0 }
0x1de3   :  { %2520 = vmatpush3.msra.mxu0 %v3074_v13 }
0x1de4   :  { %2521 = vmatprep.subr.mxu0 %v2768_v0 }
0x1de5   :  { %2522 = vmatpush3.msra.mxu0 %v3082_v44 }
0x1de6   :  { %2537 = vmatprep.subr.mxu0 %v2768_v0 }
0x1e9e   :  { %v1664_v36 = vpop.f32.mrf.mxu0 }
0x1e9f   :  { %v1668_v37 = vadd.f32 %v1664_v36, %v1131_v34 }
0x1ea0   :  { %v2503_v38 = vpop.f32.mrf.mxu0 }
0x1ea1   :  { %2658 = vtanh.f32 %v1668_v37  ;;  %v2229_v40 = vmul.f32 -1.442695, %v1668_v37  ;;  %v1348_v37 = vsel %vm1347_vm5, 1, %v2772_v50  ;;  %vm2158_vm5 = vcmask 44048  }
0x1ea3   :  { %2660 = vpow2.f32 %v2229_v40  ;;  %v1464_v40 = vsel %vm1463_vm7, 1, %v2772_v50  ;;  %vm2175_vm7 = vcmask 15360  }
0x1eae   :  { %v2659_v39 = vpop.eup %2658 }
0x1eaf   :  { %1681 = vrot.lane.b32.xlu1 %v2659_v39, %s2770_s17 }
0x1eb0   :  { %v2661_v30 = vpop.eup %2660 }
0x1eb1   :  { %v1672_v51 = vadd.f32 1.0, %v2661_v30  ;;  %v1581_v30 = vsel %vm1580_vm8, 1, %v2772_v50  ;;  %vm2177_vm8 = vcmask 44032  }
0x1eb3   :  { %2662 = vrcp.f32 %v1672_v51 }
0x1ec0   :  { %v2663_v42 = vpop.eup %2662 }
0x1ec1   :  { %v1679_v47 = vmul.f32 %v2663_v42, %v1677_v46 }
0x1f21   :  { %v1682_v35 = vpop.permute.xlu1 %1681 }
0x1f22   :  { %v1684_v45 = vmul.f32 %v2663_v42, %v1682_v35 }
0x1f24   :  { %1686 = vrot.lane.b32.xlu0 %v1684_v45, %s2771_s4 }
0x1f96   :  { %v1687_v32 = vpop.permute.xlu0 %1686 }
0x1f97   :  { %v1689_v48 = vadd.f32 %v1687_v32, %v1679_v47  ;;  %v1697_v32 = vsel %vm1696_vm11, 1, %v2772_v50 }
0x1f99   :  { %2664 = vtanh.f32 %v1689_v48  ;;  %v1794_v7 = vrot.slane %v1689_v48, 4 }
0x1fa6   :  { %v2665_v33 = vpop.eup %2664 }
0x1fa7   :  { %1692 = vrot.lane.b32.xlu1 %v2665_v33, %s2770_s17 }
0x2019   :  { %v1693_v53 = vpop.permute.xlu1 %1692 }
0x201a   :  { %v3215_v54 = vmul.f32 %v2663_v42, %v1693_v53 }
0x201c   :  { %1708 = vrot.lane.b32.xlu0 %v3215_v54, %s2771_s4 }
0x208e   :  { %v1709_v56 = vpop.permute.xlu0 %1708 }
0x208f   :  { %2513 = vmatmul.mubr.msk.f32.vlgmr.msra.gmra.mxu1 %vm179_vm2, %v1709_v56 }
0x2090   :  { %2527 = vmatpush3.msra.mxu1 %v3059_v41  ;;  %2534 = vmatprep.mubr.msk.f32.mxu1 %vm2769_vm0, %v2768_v0 }
0x2091   :  { %2528 = vmatprep.subr.mxu1 %v2768_v0 }
0x2092   :  { %2529 = vmatpush3.msra.mxu1 %v3065_v43 }
0x2093   :  { %2530 = vmatprep.subr.mxu1 %v2768_v0 }
0x2094   :  { %2531 = vmatpush3.msra.mxu1 %v3074_v13 }
0x2095   :  { %2532 = vmatprep.subr.mxu1 %v2768_v0 }
0x2096   :  { %2533 = vmatpush3.msra.mxu1 %v3082_v44 }
0x214f   :  { %v1778_v57 = vpop.f32.mrf.mxu1 }
0x2150   :  { %v1783_v58 = vrot.slane %v1778_v57, 4 }
0x2151   :  { %v2514_v2 = vpop.f32.mrf.mxu1 }
0x2152   :  { %v1785_v59 = vadd.f32 %v1783_v58, %v1131_v34  ;;  %v1814_v2 = vsel %vm1813_vm13, 1, %v2772_v50 }
0x2154   :  { %2666 = vtanh.f32 %v1785_v59  ;;  %v2231_v60 = vmul.f32 -1.442695, %v1785_v59  ;;  %v1930_v59 = vsel %vm1929_vm14, 1, %v2772_v50 }
0x2156   :  { %2668 = vpow2.f32 %v2231_v60 }
0x2161   :  { %v2667_v41 = vpop.eup %2666 }
0x2162   :  { %1798 = vrot.lane.b32.xlu1 %v2667_v41, %s2770_s17 }
0x2163   :  { %v2669_v61 = vpop.eup %2668 }
0x2164   :  { %v1789_v43 = vadd.f32 1.0, %v2669_v61 }
0x2166   :  { %2670 = vrcp.f32 %v1789_v43 }
0x2173   :  { %v2671_v4 = vpop.eup %2670 }
0x2174   :  { %v1796_v44 = vmul.f32 %v2671_v4, %v1794_v7 }
0x21d4   :  { %v1799_v62 = vpop.permute.xlu1 %1798 }
0x21d5   :  { %v1801_v13 = vmul.f32 %v2671_v4, %v1799_v62 }
0x21d7   :  { %1803 = vrot.lane.b32.xlu0 %v1801_v13, %s2771_s4 }
0x2249   :  { %v1804_v63 = vpop.permute.xlu0 %1803 }
0x224a   :  { %v1806_v49 = vadd.f32 %v1804_v63, %v1796_v44 }
0x224c   :  { %2672 = vtanh.f32 %v1806_v49  ;;  %v1910_v10 = vrot.slane %v1806_v49, 4 }
0x2259   :  { %v2673_v1 = vpop.eup %2672 }
0x225a   :  { %1809 = vrot.lane.b32.xlu1 %v2673_v1, %s2770_s17 }
0x22cc   :  { %v1810_v8 = vpop.permute.xlu1 %1809 }
0x22cd   :  { %v1812_v3 = vmul.f32 %v2671_v4, %v1810_v8 }
0x22cf   :  { %v1820_v6 = vrot.slane %v1812_v3, 4 }
0x22d1   :  { %1821 = vrot.lane.b32.xlu0 %v1820_v6, %s2771_s4 }
0x2343   :  { %v3233_v9 = vpop.permute.xlu0 %1821 }
0x2344   :  { %2524 = vmatmul.mubr.msk.f32.vlgmr.msra.gmra.mxu0 %vm179_vm2, %v3233_v9 }
0x2345   :  { %2545 = vmatprep.mubr.msk.f32.mxu0 %vm2769_vm0, %v2768_v0  ;;  %vm2046_vm0 = vcmp.eq.s32.totalorder %v3254_v27, 7 }
0x2346   :  { %v2047_v3 = vsel %vm2046_vm0, 1, %v2772_v50 }
0x2404   :  { %v1897_v14 = vpop.f32.mrf.mxu0 }
0x2405   :  { %v1901_v15 = vadd.f32 %v1897_v14, %v3241_v11  ;;  %v2065_v14 = vld [vmem:[%s3330_s8 + $0x18] sm:$0xff] }
0x2406   :  { %v2525_v16 = vpop.f32.mrf.mxu0  ;;  %2538 = vmatpush3.msra.mxu0 %v2065_v14 }
0x2407   :  { %2674 = vtanh.f32 %v1901_v15  ;;  %v2233_v18 = vmul.f32 -1.442695, %v1901_v15  ;;  %v2064_v15 = vld [vmem:[%s3330_s8 + $0x10] sm:$0xff]  ;;  %2539 = vmatprep.subr.mxu0 %v2768_v0  ;;  %v2063_v16 = vld [vmem:[%s3330_s8 + $0x8] sm:$0xff] }
0x2408   :  { %2540 = vmatpush3.msra.mxu0 %v2064_v15 }
0x2409   :  { %2676 = vpow2.f32 %v2233_v18  ;;  %2541 = vmatprep.subr.mxu0 %v2768_v0 }
0x240a   :  { %2542 = vmatpush3.msra.mxu0 %v2063_v16 }
0x240b   :  { %2543 = vmatprep.subr.mxu0 %v2768_v0 }
0x2414   :  { %v2675_v17 = vpop.eup %2674 }
0x2415   :  { %1914 = vrot.lane.b32.xlu1 %v2675_v17, %s2770_s17 }
0x2416   :  { %v2677_v19 = vpop.eup %2676 }
0x2417   :  { %v1905_v20 = vadd.f32 1.0, %v2677_v19  ;;  %v2062_v19 = vld [vmem:[%s3330_s8] sm:$0xff]  ;;  %s2774_s8 = smov 126  }
0x2418   :  { %2544 = vmatpush3.msra.mxu0 %v2062_v19 }
0x2419   :  { %2678 = vrcp.f32 %v1905_v20 }
0x2426   :  { %v2679_v21 = vpop.eup %2678 }
0x2427   :  { %v1912_v24 = vmul.f32 %v2679_v21, %v1910_v10 }
0x2487   :  { %v1915_v22 = vpop.permute.xlu1 %1914 }
0x2488   :  { %v1917_v23 = vmul.f32 %v2679_v21, %v1915_v22 }
0x248a   :  { %1919 = vrot.lane.b32.xlu0 %v1917_v23, %s2771_s4 }
0x24fc   :  { %v1920_v25 = vpop.permute.xlu0 %1919 }
0x24fd   :  { %v3248_v55 = vadd.f32 %v1920_v25, %v1912_v24  ;;  %v2236_v24 = vld [vmem:[%s3331_s9] ss:$0 sm:$0xff]  ;;  %s2775_s9 = smov [#allocation7]  }
0x24ff   :  { %2680 = vtanh.f32 %v3248_v55  ;;  %v2027_v44 = vrot.slane %v3248_v55, 4 }
0x250c   :  { %v2681_v28 = vpop.eup %2680 }
0x250d   :  { %1925 = vrot.lane.b32.xlu1 %v2681_v28, %s2770_s17 }
0x2511   :  { %1237 = vperm.xlu1 %2560, %v1235_v29  }
0x257f   :  { %v1926_v34 = vpop.permute.xlu1 %1925 }
0x2580   :  { %v3259_v36 = vmul.f32 %v2679_v21, %v1926_v34 }
0x2582   :  { %1941 = vrot.lane.b32.xlu0 %v3259_v36, %s2771_s4 }
0x2586   :  { %1350 = vperm.xlu0 %2561, %v1348_v37  }
0x258c   :  { %v1238_v38 = vpop.permute.xlu1 %1237 }
0x258d   :  { %vm1239_vm6 = vcmp.eq.s32.totalorder %v1238_v38, 1 }
0x258e   :  { %v1240_v39 = vsel %vm1239_vm6, %v3131_v26, 0.0  ;;  %vm2146_vm6 = vcmask 11264  }
0x258f   :  { %1359 = vrot.lane.b32.xlu1 %v1240_v39, %s2771_s4 }
0x2593   :  { %1466 = vperm.xlu1 %2560, %v1464_v40  }
0x2597   :  { %1583 = vperm.xlu1 %2560, %v1581_v30  }
0x25f4   :  { %v1942_v51 = vpop.permute.xlu0 %1941 }
0x25f5   :  { %2535 = vmatmul.mubr.msk.f32.vlgmr.msra.gmra.mxu1 %vm179_vm2, %v1942_v51 }
0x2601   :  { %v1351_v42 = vpop.permute.xlu0 %1350  ;;  %v1360_v35 = vpop.permute.xlu1 %1359 }
0x2602   :  { %vm1352_vm9 = vcmp.eq.s32.totalorder %v1351_v42, 1 }
0x2603   :  { %v1362_v45 = vsel %vm1352_vm9, %v3158_v52, %v1360_v35 }
0x2604   :  { %1470 = vrot.lane.b32.xlu0 %v1362_v45, %s2773_s1 }
0x260e   :  { %v1467_v26 = vpop.permute.xlu1 %1466 }
0x260f   :  { %vm1468_vm10 = vcmp.eq.s32.totalorder %v1467_v26, 1 }
0x2612   :  { %v1584_v57 = vpop.permute.xlu1 %1583 }
0x2613   :  { %vm1585_vm12 = vcmp.eq.s32.totalorder %v1584_v57, 1 }
0x2676   :  { %v1471_v46 = vpop.permute.xlu0 %1470 }
0x2677   :  { %v1473_v47 = vsel %vm1468_vm10, %v3177_v5, %v1471_v46 }
0x2678   :  { %1592 = vrot.lane.b32.xlu0 %v1473_v47, %s2771_s4 }
0x267c   :  { %1699 = vperm.xlu0 %2561, %v1697_v32  }
0x26b5   :  { %v2011_v48 = vpop.f32.mrf.mxu1 }
0x26b6   :  { %v2016_v33 = vrot.slane %v2011_v48, 4 }
0x26b7   :  { %v2536_v53 = vpop.f32.mrf.mxu1 }
0x26b8   :  { %v2018_v52 = vadd.f32 %v2016_v33, %v3241_v11 }
0x26ba   :  { %2682 = vtanh.f32 %v2018_v52  ;;  %v2235_v41 = vmul.f32 -1.442695, %v2018_v52 }
0x26bc   :  { %2684 = vpow2.f32 %v2235_v41 }
0x26c7   :  { %v2683_v56 = vpop.eup %2682 }
0x26c8   :  { %2031 = vrot.lane.b32.xlu1 %v2683_v56, %s2770_s17 }
0x26c9   :  { %v2685_v60 = vpop.eup %2684 }
0x26ca   :  { %v2022_v61 = vadd.f32 1.0, %v2685_v60 }
0x26cc   :  { %2686 = vrcp.f32 %v2022_v61 }
0x26d9   :  { %v2687_v43 = vpop.eup %2686 }
0x26da   :  { %v2029_v63 = vmul.f32 %v2687_v43, %v2027_v44 }
0x26ea   :  { %v1593_v58 = vpop.permute.xlu0 %1592 }
0x26eb   :  { %v1595_v5 = vsel %vm1585_vm12, %v3196_v31, %v1593_v58 }
0x26ec   :  { %1703 = vrot.lane.b32.xlu1 %v1595_v5, %s2773_s1 }
0x26f0   :  { %1816 = vperm.xlu1 %2560, %v1814_v2  }
0x26f4   :  { %1932 = vperm.xlu1 %2560, %v1930_v59  }
0x26f7   :  { %v1700_v31 = vpop.permute.xlu0 %1699 }
0x26f8   :  { %vm1701_vm15 = vcmp.eq.s32.totalorder %v1700_v31, 1 }
0x273a   :  { %v2032_v4 = vpop.permute.xlu1 %2031 }
0x273b   :  { %v2034_v62 = vmul.f32 %v2687_v43, %v2032_v4 }
0x273d   :  { %2036 = vrot.lane.b32.xlu0 %v2034_v62, %s2771_s4 }
0x275e   :  { %v1704_v13 = vpop.permute.xlu1 %1703 }
0x275f   :  { %v1706_v7 = vsel %vm1701_vm15, %v3215_v54, %v1704_v13 }
0x2760   :  { %1825 = vrot.lane.b32.xlu0 %v1706_v7, %s2771_s4 }
0x276b   :  { %v1817_v6 = vpop.permute.xlu1 %1816 }
0x276c   :  { %vm1818_vm1 = vcmp.eq.s32.totalorder %v1817_v6, 1 }
0x276f   :  { %v1933_v20 = vpop.permute.xlu1 %1932 }
0x2770   :  { %vm1934_vm3 = vcmp.eq.s32.totalorder %v1933_v20, 1 }
0x27af   :  { %v2037_v49 = vpop.permute.xlu0 %2036 }
0x27b0   :  { %v2039_v1 = vadd.f32 %v2037_v49, %v2029_v63 }
0x27b2   :  { %2688 = vtanh.f32 %v2039_v1 }
0x27bf   :  { %v2689_v8 = vpop.eup %2688 }
0x27c0   :  { %2042 = vrot.lane.b32.xlu0 %v2689_v8, %s2770_s17 }
0x27c4   :  { %2049 = vperm.xlu0 %2561, %v2047_v3  }
0x27d2   :  { %v1826_v11 = vpop.permute.xlu0 %1825 }
0x27d3   :  { %v1828_v54 = vsel %vm1818_vm1, %v3233_v9, %v1826_v11 }
0x27d4   :  { %1936 = vrot.lane.b32.xlu1 %v1828_v54, %s2773_s1 }
0x2832   :  { %v2043_v9 = vpop.permute.xlu0 %2042 }
0x2833   :  { %v2045_v17 = vmul.f32 %v2687_v43, %v2043_v9 }
0x2835   :  { %v2053_v18 = vrot.slane %v2045_v17, 4 }
0x2837   :  { %2054 = vrot.lane.b32.xlu1 %v2053_v18, %s2771_s4 }
0x283f   :  { %v2050_v23 = vpop.permute.xlu0 %2049 }
0x2840   :  { %vm2051_vm4 = vcmp.eq.s32.totalorder %v2050_v23, 1 }
0x2846   :  { %v1937_v21 = vpop.permute.xlu1 %1936 }
0x2847   :  { %v1939_v22 = vsel %vm1934_vm3, %v3259_v36, %v1937_v21 }
0x2848   :  { %2058 = vrot.lane.b32.xlu0 %v1939_v22, %s2771_s4  ;;  %s2185_s4 = sshll.u32 %s2775_s9, 4  ;;  %s2186_s4 = int_to_ptr.vmem [resolvable:$true] %s2185_s4 }
0x2849   :  { %s2738_s23 = scalar_lea.vmem %s2186_s4, 64  ;;  %p2743_p11 = scmp.lt.s32.totalorder %s2186_s4, %s2186_s4 }
0x284a   :  { %p2739_p10 = scmp.ne.s32.totalorder %s2186_s4, %s2738_s23  ;;  %p2744_p12 = scmp.lt.s32.totalorder %s2738_s23, %s2738_s23 }
0x284c   :  { %p2745_p13 = por %p2744_p12, %p2743_p11 }
0x284e   :  { %p2746_p0 = pnand %p2745_p13, %p2739_p10 }
0x28a9   :  { %v2055_v0 = vpop.permute.xlu1 %2054 }
0x28ba   :  { %v2059_v50 = vpop.permute.xlu0 %2058 }
0x28bb   :  { %v2061_v10 = vsel %vm2051_vm4, %v2055_v0, %v2059_v50 }
0x28bc   :  { %2546 = vmatmul.mubr.msk.f32.vlgmr.msra.gmra.mxu0 %vm179_vm2, %v2061_v10  ;;  %vm2169_vm2 = vcmask 27648  }
0x297c   :  { %v2142_v25 = vpop.f32.mrf.mxu0 }
0x297d   :  { %v2143_v55 = vadd.f32 %v2236_v24, %v2142_v25 }
0x297e   :  { %v2547_v12 = vpop.f32.mrf.mxu0 }
0x297f   :  { %v2159_v27 = vsel %vm2158_vm5, %v2143_v55, -inf  ;;  %v2147_v28 = vsel %vm2146_vm6, %v2143_v55, -inf }
0x2980   :  { %2160 = vmax.xlane.f32.xlu1 %v2159_v27  ;;  %2148 = vmax.xlane.f32.xlu0 %v2147_v28 }
0x2a09   :  { %v2161_v29 = vpop.xlane.xlu1 %2160  ;;  %v2149_v34 = vpop.xlane.xlu0 %2148 }
0x2a0a   :  { %v2162_v36 = vsub.f32 %v2143_v55, %v2161_v29  ;;  %v2150_v37 = vsub.f32 %v2143_v55, %v2149_v34 }
0x2a0c   :  { %v2163_v38 = vmul.f32 1.442695, %v2162_v36  ;;  %v2151_v39 = vmul.f32 1.442695, %v2150_v37 }
0x2a0e   :  { %2690 = vpow2.f32 %v2163_v38 }
0x2a0f   :  { %2692 = vpow2.f32 %v2151_v39 }
0x2a1b   :  { %v2691_v40 = vpop.eup %2690 }
0x2a1c   :  { %v2693_v30 = vpop.eup %2692  ;;  %2166 = vrot.lane.b32.xlu0 %v2691_v40, %s2774_s8 }
0x2a1d   :  { %v2153_v51 = vsel %vm2146_vm6, %v2693_v30, 0.0 }
0x2a1e   :  { %2154 = vadd.xlane.f32.xlu1 %v2153_v51 }
0x2a8e   :  { %v2167_v42 = vpop.permute.xlu0 %2166 }
0x2a8f   :  { %v2170_v35 = vsel %vm2169_vm2, %v2167_v42, 0.0 }
0x2a90   :  { %2171 = vadd.xlane.f32.xlu1 %v2170_v35 }
0x2aa7   :  { %v2155_v45 = vpop.xlane.xlu1 %2154 }
0x2aa8   :  { %2694 = vrcp.f32 %v2155_v45 }
0x2ab5   :  { %v2695_v46 = vpop.eup %2694 }
0x2ab6   :  { %v2157_v32 = vmul.f32 %v2695_v46, %v2693_v30 }
0x2b19   :  { %v2172_v26 = vpop.xlane.xlu1 %2171 }
0x2b1a   :  { %2696 = vrcp.f32 %v2172_v26 }
0x2b27   :  { %v2697_v47 = vpop.eup %2696 }
0x2b28   :  { %v2174_v48 = vmul.f32 %v2697_v47, %v2691_v40 }
0x2b2a   :  { %v2176_v33 = vsel %vm2175_vm7, %v2157_v32, %v2174_v48 }
0x2b2b   :  { %2178 = vst.msk [vmem:[#allocation7] sm:$0xf] %vm2177_vm8, %v2176_v33 }
0x2b2c   :  { %2749 = shalt.err (!%p2746_p0)
}
0x2b2d   :  { %2188 = dma.vmem_to_hbm [thread:$0]  %s2186_s4, 64, %s3332_s10, [#allocation4]  }
0x2b2e   :  { %2762 = dma.done.wait [#allocation4], 64  }
0x2b2f   :  { %2763 = vsyncadd [#allocation4], 4294967232 }
0x2b30   :  { %2192 = vsyncpa [#allocation3], 1 }
0x2b31   :  { %2193 = vsyncpa [#allocation6], 1 }
0x2b32   :  { %2194 = vsyncpa [#allocation4], 1 }

</bundles_post_ra>
